<compile_context>
chip_gen: v7x
topology: tpu7x:2x2x1
jax: 0.10.0
libtpu: 0.0.40
codegen_flags: <defaults>
</compile_context>

<pallas_src>
import math
import numpy as np
import jax
import jax.numpy as jnp
from jax.experimental import pallas as pl
from jax.experimental.pallas import tpu as pltpu

# ---- static configuration (small, TPU-tile friendly) ----
B = 2              # batch
L = 16             # window size / sequence length
D_MODEL = 32
N_HEADS = 4
E_HEAD = D_MODEL // N_HEADS
D_FF = 128         # 4 * d_model
EPS = 1e-5         # LayerNorm eps (PyTorch default)
PROJ_W = 128       # lane-padded width of packed [wq | wk | wv | wsig] weight

_SM_SCALE = 1.0 / math.sqrt(E_HEAD)
_INV_SQRT_2PI = 1.0 / math.sqrt(2.0 * math.pi)
_LN3 = math.log(3.0)


# ----------------------------- fused Pallas kernel -----------------------------
def _encoder_layer_kernel(x_ref, wqkvs_ref, bqkvs_ref, wo_ref, bo_ref,
                          w1_ref, b1_ref, w2_ref, b2_ref,
                          g1_ref, be1_ref, g2_ref, be2_ref, dist_ref,
                          out_ref, series_ref, prior_ref, sigma_ref):
    x = x_ref[...]                                             # [L, D] f32
    dist = dist_ref[...]                                       # [L, L] f32

    # ---- fused Q/K/V/sigma projection: one lane-dense [L,32]x[32,128] f32 matmul
    proj = jnp.dot(x, wqkvs_ref[...],
                   preferred_element_type=jnp.float32) + bqkvs_ref[...]

    ctx_heads = []
    for h in range(N_HEADS):                                   # static unroll (H=4)
        q = proj[:, h * E_HEAD:(h + 1) * E_HEAD]               # [L, E]
        k = proj[:, D_MODEL + h * E_HEAD: D_MODEL + (h + 1) * E_HEAD]
        v = proj[:, 2 * D_MODEL + h * E_HEAD: 2 * D_MODEL + (h + 1) * E_HEAD]
        s = proj[:, 3 * D_MODEL + h: 3 * D_MODEL + h + 1]      # [L, 1]

        # scores + softmax over keys (f32)
        scores = jax.lax.dot_general(
            q, k, (((1,), (1,)), ((), ())),
            preferred_element_type=jnp.float32) * _SM_SCALE    # [L, L]
        m = jnp.max(scores, axis=-1, keepdims=True)
        e = jnp.exp(scores - m)
        series = e * pl.reciprocal(jnp.sum(e, axis=-1, keepdims=True), approx=True)

        # sigma transform: sigmoid(5*s) + 1e-5 ; 3**s - 1 ; broadcast to [L, L]
        sg = 1.0 / (1.0 + jnp.exp(-5.0 * s)) + 1e-5
        sg = jnp.exp(sg * _LN3) - 1.0
        sig_full = jnp.broadcast_to(sg, (L, L))

        # prior: Gaussian density of |i-j| with per-row sigma
        prior = (_INV_SQRT_2PI * pl.reciprocal(sig_full, approx=True)
                 * jnp.exp(-(dist * dist) / (2.0 * sig_full * sig_full)))

        # per-head context (bf16 MXU inputs, f32 accumulation)
        ctx = jnp.dot(series.astype(jnp.bfloat16), v.astype(jnp.bfloat16),
                      preferred_element_type=jnp.float32)      # [L, E]

        series_ref[h, :, :] = series
        prior_ref[h, :, :] = prior
        sigma_ref[h, :, :] = sig_full
        ctx_heads.append(ctx)

    ctx_all = jnp.concatenate(ctx_heads, axis=-1)              # [L, D]

    # ---- output projection (bf16 weights) + residual + norm1
    new_x = jnp.dot(ctx_all.astype(jnp.bfloat16), wo_ref[...],
                    preferred_element_type=jnp.float32) + bo_ref[...]
    z1 = x + new_x                                             # dropout = identity (eval)
    mu1 = jnp.mean(z1, axis=-1, keepdims=True)
    zc1 = z1 - mu1
    var1 = jnp.mean(zc1 * zc1, axis=-1, keepdims=True)
    x1 = zc1 * jax.lax.rsqrt(var1 + EPS) * g1_ref[...] + be1_ref[...]

    # ---- FFN: conv1(k=1) -> relu -> conv2(k=1)   (bf16 weights, f32 acc)
    hdn = jnp.dot(x1.astype(jnp.bfloat16), w1_ref[...],
                  preferred_element_type=jnp.float32) + b1_ref[...]
    hdn = jnp.maximum(hdn, 0.0)
    y = jnp.dot(hdn.astype(jnp.bfloat16), w2_ref[...],
                preferred_element_type=jnp.float32) + b2_ref[...]

    # ---- residual + norm2
    z2 = x1 + y
    mu2 = jnp.mean(z2, axis=-1, keepdims=True)
    zc2 = z2 - mu2
    var2 = jnp.mean(zc2 * zc2, axis=-1, keepdims=True)
    out_ref[...] = zc2 * jax.lax.rsqrt(var2 + EPS) * g2_ref[...] + be2_ref[...]


# ----------------------------- wrapper -----------------------------
def encoder_layer(x, kp):
    def rep2(shape):                      # replicated 2-D param, same block every step
        return pl.BlockSpec(shape, lambda b: (0, 0))

    per_b3 = pl.BlockSpec((None, L, D_MODEL), lambda b: (b, 0, 0))
    per_b4 = pl.BlockSpec((None, N_HEADS, L, L), lambda b: (b, 0, 0, 0))

    out_shapes = (
        jax.ShapeDtypeStruct((B, L, D_MODEL), jnp.float32),        # out
        jax.ShapeDtypeStruct((B, N_HEADS, L, L), jnp.float32),     # series (attn)
        jax.ShapeDtypeStruct((B, N_HEADS, L, L), jnp.float32),     # prior  (mask)
        jax.ShapeDtypeStruct((B, N_HEADS, L, L), jnp.float32),     # sigma
    )
    return pl.pallas_call(
        _encoder_layer_kernel,
        out_shape=out_shapes,
        grid=(B,),
        in_specs=[per_b3,
                  rep2((D_MODEL, PROJ_W)), rep2((1, PROJ_W)),
                  rep2((D_MODEL, D_MODEL)), rep2((1, D_MODEL)),
                  rep2((D_MODEL, D_FF)), rep2((1, D_FF)),
                  rep2((D_FF, D_MODEL)), rep2((1, D_MODEL)),
                  rep2((1, D_MODEL)), rep2((1, D_MODEL)),
                  rep2((1, D_MODEL)), rep2((1, D_MODEL)),
                  rep2((L, L))],
        out_specs=(per_b3, per_b4, per_b4, per_b4),
        compiler_params=pltpu.CompilerParams(
            dimension_semantics=("parallel",)),   # lets a 2-TC chip shard over B
    )(x, kp['wqkvs'], kp['bqkvs'], kp['wo'], kp['bo'],
      kp['w1'], kp['b1'], kp['w2'], kp['b2'],
      kp['ln1_g'], kp['ln1_b'], kp['ln2_g'], kp['ln2_b'], kp['dist'])


# ----------------------------- reference (plain JAX, f32) -----------------------------
def reference(x, p):
    Bx, Lx, Dx = x.shape
    xf = x.reshape(-1, Dx)
    q = (xf @ p['wq'] + p['bq']).reshape(Bx, Lx, N_HEADS, E_HEAD).transpose(0, 2, 1, 3)
    k = (xf @ p['wk'] + p['bk']).reshape(Bx, Lx, N_HEADS, E_HEAD).transpose(0, 2, 1, 3)
    v = (xf @ p['wv'] + p['bv']).reshape(Bx, Lx, N_HEADS, E_HEAD).transpose(0, 2, 1, 3)
    scores = jnp.einsum('bhle,bhse->bhls', q, k) / math.sqrt(E_HEAD)
    series = jax.nn.softmax(scores, axis=-1)
    sig = (xf @ p['wsig'] + p['bsig']).reshape(Bx, Lx, N_HEADS).transpose(0, 2, 1)
    sig = jax.nn.sigmoid(sig * 5.0) + 1e-5
    sig = 3.0 ** sig - 1.0
    sig_full = jnp.broadcast_to(sig[..., None], (Bx, N_HEADS, Lx, Lx))
    prior = 1.0 / (math.sqrt(2 * math.pi) * sig_full) * \
        jnp.exp(-p['dist'] ** 2 / (2.0 * sig_full ** 2))
    heads = jnp.einsum('bhls,bhse->bhle', series, v)
    newx = heads.transpose(0, 2, 1, 3).reshape(-1, Dx) @ p['wo'] + p['bo']

    def ln(z, g, b):
        mu = z.mean(-1, keepdims=True)
        va = ((z - mu) ** 2).mean(-1, keepdims=True)
        return (z - mu) / jnp.sqrt(va + EPS) * g + b

    x1 = ln(xf + newx, p['ln1_g'], p['ln1_b'])
    h = jnp.maximum(x1 @ p['w1'] + p['b1'], 0.0)
    y = h @ p['w2'] + p['b2']
    out = ln(x1 + y, p['ln2_g'], p['ln2_b']).reshape(Bx, Lx, Dx)
    return out, series, prior, sig_full


# ----------------------------- parameters -----------------------------
def init_params(key):
    ks = jax.random.split(key, 12)

    def w(k, shape, fan_in):
        return jax.random.normal(k, shape, jnp.float32) / math.sqrt(fan_in)

    ii, jj = jnp.meshgrid(jnp.arange(L), jnp.arange(L), indexing='ij')
    return {
        'wq': w(ks[0], (D_MODEL, D_MODEL), D_MODEL), 'bq': jnp.zeros((D_MODEL,), jnp.float32),
        'wk': w(ks[1], (D_MODEL, D_MODEL), D_MODEL), 'bk': jnp.zeros((D_MODEL,), jnp.float32),
        'wv': w(ks[2], (D_MODEL, D_MODEL), D_MODEL), 'bv': jnp.zeros((D_MODEL,), jnp.float32),
        'wsig': w(ks[3], (D_MODEL, N_HEADS), D_MODEL), 'bsig': jnp.zeros((N_HEADS,), jnp.float32),
        'wo': w(ks[4], (D_MODEL, D_MODEL), D_MODEL), 'bo': jnp.zeros((D_MODEL,), jnp.float32),
        # conv1: [d_ff, d_model, 1] -> matmul weight [d_model, d_ff]; conv2 similarly
        'w1': w(ks[5], (D_MODEL, D_FF), D_MODEL), 'b1': 0.01 * jnp.ones((D_FF,), jnp.float32),
        'w2': w(ks[6], (D_FF, D_MODEL), D_FF),    'b2': 0.01 * jnp.ones((D_MODEL,), jnp.float32),
        'ln1_g': jnp.ones((D_MODEL,), jnp.float32), 'ln1_b': jnp.zeros((D_MODEL,), jnp.float32),
        'ln2_g': jnp.ones((D_MODEL,), jnp.float32), 'ln2_b': jnp.zeros((D_MODEL,), jnp.float32),
        'dist': jnp.abs(ii - jj).astype(jnp.float32),   # AnomalyAttention distances
    }


def pack_params(p):
    """One-time packing: fused lane-dense QKV+sigma weight, bf16 MXU weights, 2D biases."""
    wqkvs = jnp.zeros((D_MODEL, PROJ_W), jnp.float32)
    wqkvs = wqkvs.at[:, 0:D_MODEL].set(p['wq'])
    wqkvs = wqkvs.at[:, D_MODEL:2 * D_MODEL].set(p['wk'])
    wqkvs = wqkvs.at[:, 2 * D_MODEL:3 * D_MODEL].set(p['wv'])
    wqkvs = wqkvs.at[:, 3 * D_MODEL:3 * D_MODEL + N_HEADS].set(p['wsig'])
    bqkvs = jnp.zeros((PROJ_W,), jnp.float32)
    bqkvs = bqkvs.at[0:D_MODEL].set(p['bq'])
    bqkvs = bqkvs.at[D_MODEL:2 * D_MODEL].set(p['bk'])
    bqkvs = bqkvs.at[2 * D_MODEL:3 * D_MODEL].set(p['bv'])
    bqkvs = bqkvs.at[3 * D_MODEL:3 * D_MODEL + N_HEADS].set(p['bsig'])
    bf16 = jnp.bfloat16
    return {
        'wqkvs': wqkvs, 'bqkvs': bqkvs.reshape(1, PROJ_W),
        'wo': p['wo'].astype(bf16), 'bo': p['bo'].reshape(1, D_MODEL),
        'w1': p['w1'].astype(bf16), 'b1': p['b1'].reshape(1, D_FF),
        'w2': p['w2'].astype(bf16), 'b2': p['b2'].reshape(1, D_MODEL),
        'ln1_g': p['ln1_g'].reshape(1, D_MODEL), 'ln1_b': p['ln1_b'].reshape(1, D_MODEL),
        'ln2_g': p['ln2_g'].reshape(1, D_MODEL), 'ln2_b': p['ln2_b'].reshape(1, D_MODEL),
        'dist': p['dist'],
    }


if __name__ == "__main__":
    key = jax.random.PRNGKey(0)
    kx, kparam = jax.random.split(key)
    params = init_params(kparam)
    x = jax.random.normal(kx, (B, L, D_MODEL), jnp.float32)

    packed = pack_params(params)                 # done once, outside the kernel
    fwd = jax.jit(encoder_layer)
    out, series, prior, sigma = fwd(x, packed)
    jax.block_until_ready((out, series, prior, sigma))

    # correctness check vs plain-JAX f32 reference
    ref_out, ref_series, ref_prior, ref_sigma = reference(x, params)
    # series / prior / sigma are computed on the f32 path (approx reciprocal only)
    # -> 1e-2 tolerance.  `out` goes through bf16-operand MXU matmuls with f32
    # accumulation and two LayerNorms -> 3e-2 tolerance.
    assert np.allclose(np.asarray(series), np.asarray(ref_series), rtol=1e-2, atol=1e-2)
    assert np.allclose(np.asarray(prior), np.asarray(ref_prior), rtol=1e-2, atol=1e-2)
    assert np.allclose(np.asarray(sigma), np.asarray(ref_sigma), rtol=1e-2, atol=1e-2)
    assert np.allclose(np.asarray(out), np.asarray(ref_out), rtol=3e-2, atol=3e-2)

    print("KERNEL_OK")
</pallas_src>

<mosaic_0001>
module attributes {stable_mosaic.version = 11 : i64} {
  func.func @_encoder_layer_kernel(%arg0: i32, %arg1: memref<1x16x32xf32, #tpu.memory_space<vmem>>, %arg2: memref<32x128xf32, #tpu.memory_space<vmem>>, %arg3: memref<1x128xf32, #tpu.memory_space<vmem>>, %arg4: memref<32x32xbf16, #tpu.memory_space<vmem>>, %arg5: memref<1x32xf32, #tpu.memory_space<vmem>>, %arg6: memref<32x128xbf16, #tpu.memory_space<vmem>>, %arg7: memref<1x128xf32, #tpu.memory_space<vmem>>, %arg8: memref<128x32xbf16, #tpu.memory_space<vmem>>, %arg9: memref<1x32xf32, #tpu.memory_space<vmem>>, %arg10: memref<1x32xf32, #tpu.memory_space<vmem>>, %arg11: memref<1x32xf32, #tpu.memory_space<vmem>>, %arg12: memref<1x32xf32, #tpu.memory_space<vmem>>, %arg13: memref<1x32xf32, #tpu.memory_space<vmem>>, %arg14: memref<16x16xf32, #tpu.memory_space<vmem>>, %arg15: memref<1x16x32xf32, #tpu.memory_space<vmem>>, %arg16: memref<1x4x16x16xf32, #tpu.memory_space<vmem>>, %arg17: memref<1x4x16x16xf32, #tpu.memory_space<vmem>>, %arg18: memref<1x4x16x16xf32, #tpu.memory_space<vmem>>) attributes {dimension_semantics = [#tpu.dimension_semantics<parallel>], iteration_bounds = array<i64: 2>, scalar_prefetch = 0 : i64, scratch_operands = 0 : i64, tpu.core_type = #tpu.core_type<tc>, window_params = [{transform_indices = @transform_0, window_bounds = array<i64: 1, 16, 32>}, {pipeline_mode = #tpu.pipeline_mode<synchronous>, transform_indices = @transform_1, window_bounds = array<i64: 32, 128>}, {pipeline_mode = #tpu.pipeline_mode<synchronous>, transform_indices = @transform_2, window_bounds = array<i64: 1, 128>}, {pipeline_mode = #tpu.pipeline_mode<synchronous>, transform_indices = @transform_3, window_bounds = array<i64: 32, 32>}, {pipeline_mode = #tpu.pipeline_mode<synchronous>, transform_indices = @transform_4, window_bounds = array<i64: 1, 32>}, {pipeline_mode = #tpu.pipeline_mode<synchronous>, transform_indices = @transform_5, window_bounds = array<i64: 32, 128>}, {pipeline_mode = #tpu.pipeline_mode<synchronous>, transform_indices = @transform_6, window_bounds = array<i64: 1, 128>}, {pipeline_mode = #tpu.pipeline_mode<synchronous>, transform_indices = @transform_7, window_bounds = array<i64: 128, 32>}, {pipeline_mode = #tpu.pipeline_mode<synchronous>, transform_indices = @transform_8, window_bounds = array<i64: 1, 32>}, {pipeline_mode = #tpu.pipeline_mode<synchronous>, transform_indices = @transform_9, window_bounds = array<i64: 1, 32>}, {pipeline_mode = #tpu.pipeline_mode<synchronous>, transform_indices = @transform_10, window_bounds = array<i64: 1, 32>}, {pipeline_mode = #tpu.pipeline_mode<synchronous>, transform_indices = @transform_11, window_bounds = array<i64: 1, 32>}, {pipeline_mode = #tpu.pipeline_mode<synchronous>, transform_indices = @transform_12, window_bounds = array<i64: 1, 32>}, {pipeline_mode = #tpu.pipeline_mode<synchronous>, transform_indices = @transform_13, window_bounds = array<i64: 16, 16>}, {transform_indices = @transform_14, window_bounds = array<i64: 1, 16, 32>}, {transform_indices = @transform_15, window_bounds = array<i64: 1, 4, 16, 16>}, {transform_indices = @transform_16, window_bounds = array<i64: 1, 4, 16, 16>}, {transform_indices = @transform_17, window_bounds = array<i64: 1, 4, 16, 16>}]} {
    %c0 = arith.constant 0 : index
    %c0_0 = arith.constant 0 : index
    %c0_1 = arith.constant 0 : index
    %0 = vector.load %arg1[%c0, %c0_0, %c0_1] : memref<1x16x32xf32, #tpu.memory_space<vmem>>, vector<1x16x32xf32>
    %1 = vector.shape_cast %0 : vector<1x16x32xf32> to vector<16x32xf32>
    %c0_2 = arith.constant 0 : index
    %c0_3 = arith.constant 0 : index
    %2 = vector.load %arg14[%c0_2, %c0_3] : memref<16x16xf32, #tpu.memory_space<vmem>>, vector<16x16xf32>
    %c0_4 = arith.constant 0 : index
    %c0_5 = arith.constant 0 : index
    %3 = vector.load %arg2[%c0_4, %c0_5] : memref<32x128xf32, #tpu.memory_space<vmem>>, vector<32x128xf32>
    %cst = arith.constant dense<0.000000e+00> : vector<16x128xf32>
    %4 = tpu.matmul %1, %3, %cst {dimension_numbers = #tpu.dot_dimension_numbers<[1], [0], [0], [1], [0, 0, 1, 1], [], []>} : vector<16x32xf32>, vector<32x128xf32>, vector<16x128xf32> -> vector<16x128xf32>
    %c0_6 = arith.constant 0 : index
    %c0_7 = arith.constant 0 : index
    %5 = vector.load %arg3[%c0_6, %c0_7] : memref<1x128xf32, #tpu.memory_space<vmem>>, vector<1x128xf32>
    %6 = vector.broadcast %5 : vector<1x128xf32> to vector<16x128xf32>
    %7 = arith.addf %4, %6 : vector<16x128xf32>
    %8 = vector.extract_strided_slice %7 {offsets = [0, 0], sizes = [16, 8], strides = [1, 1]} : vector<16x128xf32> to vector<16x8xf32>
    %9 = vector.extract_strided_slice %7 {offsets = [0, 32], sizes = [16, 8], strides = [1, 1]} : vector<16x128xf32> to vector<16x8xf32>
    %10 = vector.extract_strided_slice %7 {offsets = [0, 64], sizes = [16, 8], strides = [1, 1]} : vector<16x128xf32> to vector<16x8xf32>
    %11 = vector.extract_strided_slice %7 {offsets = [0, 96], sizes = [16, 1], strides = [1, 1]} : vector<16x128xf32> to vector<16x1xf32>
    %cst_8 = arith.constant dense<0.000000e+00> : vector<16x16xf32>
    %12 = tpu.matmul %8, %9, %cst_8 {dimension_numbers = #tpu.dot_dimension_numbers<[1], [1], [0], [0], [0, 0, 1, 0], [], []>} : vector<16x8xf32>, vector<16x8xf32>, vector<16x16xf32> -> vector<16x16xf32>
    %cst_9 = arith.constant 0.353553385 : f32
    %13 = vector.broadcast %cst_9 : f32 to vector<16x16xf32>
    %14 = arith.mulf %12, %13 : vector<16x16xf32>
    %cst_10 = arith.constant dense<0xFF800000> : vector<16xf32>
    %15 = vector.multi_reduction <maximumf>, %14, %cst_10 [1] : vector<16x16xf32> to vector<16xf32>
    %16 = vector.shape_cast %15 : vector<16xf32> to vector<16x1xf32>
    %17 = vector.broadcast %16 : vector<16x1xf32> to vector<16x16xf32>
    %18 = arith.subf %14, %17 : vector<16x16xf32>
    %19 = math.exp %18 : vector<16x16xf32>
    %cst_11 = arith.constant dense<0.000000e+00> : vector<16xf32>
    %20 = vector.multi_reduction <add>, %19, %cst_11 [1] : vector<16x16xf32> to vector<16xf32>
    %21 = vector.shape_cast %20 : vector<16xf32> to vector<16x1xf32>
    %22 = tpu.reciprocal %21 {approx = true} : vector<16x1xf32> -> vector<16x1xf32>
    %23 = vector.broadcast %22 : vector<16x1xf32> to vector<16x16xf32>
    %24 = arith.mulf %19, %23 : vector<16x16xf32>
    %cst_12 = arith.constant -5.000000e+00 : f32
    %25 = vector.broadcast %cst_12 : f32 to vector<16x1xf32>
    %26 = arith.mulf %25, %11 : vector<16x1xf32>
    %27 = math.exp %26 : vector<16x1xf32>
    %cst_13 = arith.constant 1.000000e+00 : f32
    %28 = vector.broadcast %cst_13 : f32 to vector<16x1xf32>
    %29 = arith.addf %28, %27 : vector<16x1xf32>
    %cst_14 = arith.constant 1.000000e+00 : f32
    %30 = vector.broadcast %cst_14 : f32 to vector<16x1xf32>
    %31 = arith.divf %30, %29 : vector<16x1xf32>
    %cst_15 = arith.constant 9.99999974E-6 : f32
    %32 = vector.broadcast %cst_15 : f32 to vector<16x1xf32>
    %33 = arith.addf %31, %32 : vector<16x1xf32>
    %cst_16 = arith.constant 1.09861231 : f32
    %34 = vector.broadcast %cst_16 : f32 to vector<16x1xf32>
    %35 = arith.mulf %33, %34 : vector<16x1xf32>
    %36 = math.exp %35 : vector<16x1xf32>
    %cst_17 = arith.constant 1.000000e+00 : f32
    %37 = vector.broadcast %cst_17 : f32 to vector<16x1xf32>
    %38 = arith.subf %36, %37 : vector<16x1xf32>
    %39 = vector.shape_cast %38 : vector<16x1xf32> to vector<16x1xf32>
    %40 = vector.broadcast %39 : vector<16x1xf32> to vector<16x16xf32>
    %41 = tpu.reciprocal %40 {approx = true} : vector<16x16xf32> -> vector<16x16xf32>
    %cst_18 = arith.constant 0.398942292 : f32
    %42 = vector.broadcast %cst_18 : f32 to vector<16x16xf32>
    %43 = arith.mulf %42, %41 : vector<16x16xf32>
    %44 = arith.mulf %2, %2 : vector<16x16xf32>
    %cst_19 = arith.constant 0.000000e+00 : f32
    %45 = vector.broadcast %cst_19 : f32 to vector<16x16xf32>
    %46 = arith.subf %45, %44 : vector<16x16xf32>
    %cst_20 = arith.constant 2.000000e+00 : f32
    %47 = vector.broadcast %cst_20 : f32 to vector<16x16xf32>
    %48 = arith.mulf %47, %40 : vector<16x16xf32>
    %49 = arith.mulf %48, %40 : vector<16x16xf32>
    %50 = arith.divf %46, %49 : vector<16x16xf32>
    %51 = math.exp %50 : vector<16x16xf32>
    %52 = arith.mulf %43, %51 : vector<16x16xf32>
    %53 = arith.truncf %24 : vector<16x16xf32> to vector<16x16xbf16>
    %54 = arith.truncf %10 : vector<16x8xf32> to vector<16x8xbf16>
    %cst_21 = arith.constant dense<0.000000e+00> : vector<16x8xf32>
    %55 = tpu.matmul %53, %54, %cst_21 {dimension_numbers = #tpu.dot_dimension_numbers<[1], [0], [0], [1], [0, 0, 1, 1], [], []>} : vector<16x16xbf16>, vector<16x8xbf16>, vector<16x8xf32> -> vector<16x8xf32>
    %c0_22 = arith.constant 0 : index
    %c0_23 = arith.constant 0 : index
    %c0_24 = arith.constant 0 : index
    %c0_25 = arith.constant 0 : index
    %56 = vector.load %arg16[%c0_22, %c0_23, %c0_24, %c0_25] : memref<1x4x16x16xf32, #tpu.memory_space<vmem>>, vector<1x1x16x16xf32>
    %57 = vector.shape_cast %56 : vector<1x1x16x16xf32> to vector<16x16xf32>
    %58 = vector.shape_cast %24 : vector<16x16xf32> to vector<1x1x16x16xf32>
    tpu.vector_store %arg16[%c0_22, %c0_23, %c0_24, %c0_25], %58 {strides = array<i32>} : memref<1x4x16x16xf32, #tpu.memory_space<vmem>>, vector<1x1x16x16xf32>,
    %c0_26 = arith.constant 0 : index
    %c0_27 = arith.constant 0 : index
    %c0_28 = arith.constant 0 : index
    %c0_29 = arith.constant 0 : index
    %59 = vector.load %arg17[%c0_26, %c0_27, %c0_28, %c0_29] : memref<1x4x16x16xf32, #tpu.memory_space<vmem>>, vector<1x1x16x16xf32>
    %60 = vector.shape_cast %59 : vector<1x1x16x16xf32> to vector<16x16xf32>
    %61 = vector.shape_cast %52 : vector<16x16xf32> to vector<1x1x16x16xf32>
    tpu.vector_store %arg17[%c0_26, %c0_27, %c0_28, %c0_29], %61 {strides = array<i32>} : memref<1x4x16x16xf32, #tpu.memory_space<vmem>>, vector<1x1x16x16xf32>,
    %c0_30 = arith.constant 0 : index
    %c0_31 = arith.constant 0 : index
    %c0_32 = arith.constant 0 : index
    %c0_33 = arith.constant 0 : index
    %62 = vector.load %arg18[%c0_30, %c0_31, %c0_32, %c0_33] : memref<1x4x16x16xf32, #tpu.memory_space<vmem>>, vector<1x1x16x16xf32>
    %63 = vector.shape_cast %62 : vector<1x1x16x16xf32> to vector<16x16xf32>
    %64 = vector.shape_cast %40 : vector<16x16xf32> to vector<1x1x16x16xf32>
    tpu.vector_store %arg18[%c0_30, %c0_31, %c0_32, %c0_33], %64 {strides = array<i32>} : memref<1x4x16x16xf32, #tpu.memory_space<vmem>>, vector<1x1x16x16xf32>,
    %65 = vector.extract_strided_slice %7 {offsets = [0, 8], sizes = [16, 8], strides = [1, 1]} : vector<16x128xf32> to vector<16x8xf32>
    %66 = vector.extract_strided_slice %7 {offsets = [0, 40], sizes = [16, 8], strides = [1, 1]} : vector<16x128xf32> to vector<16x8xf32>
    %67 = vector.extract_strided_slice %7 {offsets = [0, 72], sizes = [16, 8], strides = [1, 1]} : vector<16x128xf32> to vector<16x8xf32>
    %68 = vector.extract_strided_slice %7 {offsets = [0, 97], sizes = [16, 1], strides = [1, 1]} : vector<16x128xf32> to vector<16x1xf32>
    %cst_34 = arith.constant dense<0.000000e+00> : vector<16x16xf32>
    %69 = tpu.matmul %65, %66, %cst_34 {dimension_numbers = #tpu.dot_dimension_numbers<[1], [1], [0], [0], [0, 0, 1, 0], [], []>} : vector<16x8xf32>, vector<16x8xf32>, vector<16x16xf32> -> vector<16x16xf32>
    %cst_35 = arith.constant 0.353553385 : f32
    %70 = vector.broadcast %cst_35 : f32 to vector<16x16xf32>
    %71 = arith.mulf %69, %70 : vector<16x16xf32>
    %cst_36 = arith.constant dense<0xFF800000> : vector<16xf32>
    %72 = vector.multi_reduction <maximumf>, %71, %cst_36 [1] : vector<16x16xf32> to vector<16xf32>
    %73 = vector.shape_cast %72 : vector<16xf32> to vector<16x1xf32>
    %74 = vector.broadcast %73 : vector<16x1xf32> to vector<16x16xf32>
    %75 = arith.subf %71, %74 : vector<16x16xf32>
    %76 = math.exp %75 : vector<16x16xf32>
    %cst_37 = arith.constant dense<0.000000e+00> : vector<16xf32>
    %77 = vector.multi_reduction <add>, %76, %cst_37 [1] : vector<16x16xf32> to vector<16xf32>
    %78 = vector.shape_cast %77 : vector<16xf32> to vector<16x1xf32>
    %79 = tpu.reciprocal %78 {approx = true} : vector<16x1xf32> -> vector<16x1xf32>
    %80 = vector.broadcast %79 : vector<16x1xf32> to vector<16x16xf32>
    %81 = arith.mulf %76, %80 : vector<16x16xf32>
    %cst_38 = arith.constant -5.000000e+00 : f32
    %82 = vector.broadcast %cst_38 : f32 to vector<16x1xf32>
    %83 = arith.mulf %82, %68 : vector<16x1xf32>
    %84 = math.exp %83 : vector<16x1xf32>
    %cst_39 = arith.constant 1.000000e+00 : f32
    %85 = vector.broadcast %cst_39 : f32 to vector<16x1xf32>
    %86 = arith.addf %85, %84 : vector<16x1xf32>
    %cst_40 = arith.constant 1.000000e+00 : f32
    %87 = vector.broadcast %cst_40 : f32 to vector<16x1xf32>
    %88 = arith.divf %87, %86 : vector<16x1xf32>
    %cst_41 = arith.constant 9.99999974E-6 : f32
    %89 = vector.broadcast %cst_41 : f32 to vector<16x1xf32>
    %90 = arith.addf %88, %89 : vector<16x1xf32>
    %cst_42 = arith.constant 1.09861231 : f32
    %91 = vector.broadcast %cst_42 : f32 to vector<16x1xf32>
    %92 = arith.mulf %90, %91 : vector<16x1xf32>
    %93 = math.exp %92 : vector<16x1xf32>
    %cst_43 = arith.constant 1.000000e+00 : f32
    %94 = vector.broadcast %cst_43 : f32 to vector<16x1xf32>
    %95 = arith.subf %93, %94 : vector<16x1xf32>
    %96 = vector.shape_cast %95 : vector<16x1xf32> to vector<16x1xf32>
    %97 = vector.broadcast %96 : vector<16x1xf32> to vector<16x16xf32>
    %98 = tpu.reciprocal %97 {approx = true} : vector<16x16xf32> -> vector<16x16xf32>
    %cst_44 = arith.constant 0.398942292 : f32
    %99 = vector.broadcast %cst_44 : f32 to vector<16x16xf32>
    %100 = arith.mulf %99, %98 : vector<16x16xf32>
    %101 = arith.mulf %2, %2 : vector<16x16xf32>
    %cst_45 = arith.constant 0.000000e+00 : f32
    %102 = vector.broadcast %cst_45 : f32 to vector<16x16xf32>
    %103 = arith.subf %102, %101 : vector<16x16xf32>
    %cst_46 = arith.constant 2.000000e+00 : f32
    %104 = vector.broadcast %cst_46 : f32 to vector<16x16xf32>
    %105 = arith.mulf %104, %97 : vector<16x16xf32>
    %106 = arith.mulf %105, %97 : vector<16x16xf32>
    %107 = arith.divf %103, %106 : vector<16x16xf32>
    %108 = math.exp %107 : vector<16x16xf32>
    %109 = arith.mulf %100, %108 : vector<16x16xf32>
    %110 = arith.truncf %81 : vector<16x16xf32> to vector<16x16xbf16>
    %111 = arith.truncf %67 : vector<16x8xf32> to vector<16x8xbf16>
    %cst_47 = arith.constant dense<0.000000e+00> : vector<16x8xf32>
    %112 = tpu.matmul %110, %111, %cst_47 {dimension_numbers = #tpu.dot_dimension_numbers<[1], [0], [0], [1], [0, 0, 1, 1], [], []>} : vector<16x16xbf16>, vector<16x8xbf16>, vector<16x8xf32> -> vector<16x8xf32>
    %c0_48 = arith.constant 0 : index
    %c1 = arith.constant 1 : index
    %c0_49 = arith.constant 0 : index
    %c0_50 = arith.constant 0 : index
    %113 = vector.load %arg16[%c0_48, %c1, %c0_49, %c0_50] : memref<1x4x16x16xf32, #tpu.memory_space<vmem>>, vector<1x1x16x16xf32>
    %114 = vector.shape_cast %113 : vector<1x1x16x16xf32> to vector<16x16xf32>
    %115 = vector.shape_cast %81 : vector<16x16xf32> to vector<1x1x16x16xf32>
    tpu.vector_store %arg16[%c0_48, %c1, %c0_49, %c0_50], %115 {strides = array<i32>} : memref<1x4x16x16xf32, #tpu.memory_space<vmem>>, vector<1x1x16x16xf32>,
    %c0_51 = arith.constant 0 : index
    %c1_52 = arith.constant 1 : index
    %c0_53 = arith.constant 0 : index
    %c0_54 = arith.constant 0 : index
    %116 = vector.load %arg17[%c0_51, %c1_52, %c0_53, %c0_54] : memref<1x4x16x16xf32, #tpu.memory_space<vmem>>, vector<1x1x16x16xf32>
    %117 = vector.shape_cast %116 : vector<1x1x16x16xf32> to vector<16x16xf32>
    %118 = vector.shape_cast %109 : vector<16x16xf32> to vector<1x1x16x16xf32>
    tpu.vector_store %arg17[%c0_51, %c1_52, %c0_53, %c0_54], %118 {strides = array<i32>} : memref<1x4x16x16xf32, #tpu.memory_space<vmem>>, vector<1x1x16x16xf32>,
    %c0_55 = arith.constant 0 : index
    %c1_56 = arith.constant 1 : index
    %c0_57 = arith.constant 0 : index
    %c0_58 = arith.constant 0 : index
    %119 = vector.load %arg18[%c0_55, %c1_56, %c0_57, %c0_58] : memref<1x4x16x16xf32, #tpu.memory_space<vmem>>, vector<1x1x16x16xf32>
    %120 = vector.shape_cast %119 : vector<1x1x16x16xf32> to vector<16x16xf32>
    %121 = vector.shape_cast %97 : vector<16x16xf32> to vector<1x1x16x16xf32>
    tpu.vector_store %arg18[%c0_55, %c1_56, %c0_57, %c0_58], %121 {strides = array<i32>} : memref<1x4x16x16xf32, #tpu.memory_space<vmem>>, vector<1x1x16x16xf32>,
    %122 = vector.extract_strided_slice %7 {offsets = [0, 16], sizes = [16, 8], strides = [1, 1]} : vector<16x128xf32> to vector<16x8xf32>
    %123 = vector.extract_strided_slice %7 {offsets = [0, 48], sizes = [16, 8], strides = [1, 1]} : vector<16x128xf32> to vector<16x8xf32>
    %124 = vector.extract_strided_slice %7 {offsets = [0, 80], sizes = [16, 8], strides = [1, 1]} : vector<16x128xf32> to vector<16x8xf32>
    %125 = vector.extract_strided_slice %7 {offsets = [0, 98], sizes = [16, 1], strides = [1, 1]} : vector<16x128xf32> to vector<16x1xf32>
    %cst_59 = arith.constant dense<0.000000e+00> : vector<16x16xf32>
    %126 = tpu.matmul %122, %123, %cst_59 {dimension_numbers = #tpu.dot_dimension_numbers<[1], [1], [0], [0], [0, 0, 1, 0], [], []>} : vector<16x8xf32>, vector<16x8xf32>, vector<16x16xf32> -> vector<16x16xf32>
    %cst_60 = arith.constant 0.353553385 : f32
    %127 = vector.broadcast %cst_60 : f32 to vector<16x16xf32>
    %128 = arith.mulf %126, %127 : vector<16x16xf32>
    %cst_61 = arith.constant dense<0xFF800000> : vector<16xf32>
    %129 = vector.multi_reduction <maximumf>, %128, %cst_61 [1] : vector<16x16xf32> to vector<16xf32>
    %130 = vector.shape_cast %129 : vector<16xf32> to vector<16x1xf32>
    %131 = vector.broadcast %130 : vector<16x1xf32> to vector<16x16xf32>
    %132 = arith.subf %128, %131 : vector<16x16xf32>
    %133 = math.exp %132 : vector<16x16xf32>
    %cst_62 = arith.constant dense<0.000000e+00> : vector<16xf32>
    %134 = vector.multi_reduction <add>, %133, %cst_62 [1] : vector<16x16xf32> to vector<16xf32>
    %135 = vector.shape_cast %134 : vector<16xf32> to vector<16x1xf32>
    %136 = tpu.reciprocal %135 {approx = true} : vector<16x1xf32> -> vector<16x1xf32>
    %137 = vector.broadcast %136 : vector<16x1xf32> to vector<16x16xf32>
    %138 = arith.mulf %133, %137 : vector<16x16xf32>
    %cst_63 = arith.constant -5.000000e+00 : f32
    %139 = vector.broadcast %cst_63 : f32 to vector<16x1xf32>
    %140 = arith.mulf %139, %125 : vector<16x1xf32>
    %141 = math.exp %140 : vector<16x1xf32>
    %cst_64 = arith.constant 1.000000e+00 : f32
    %142 = vector.broadcast %cst_64 : f32 to vector<16x1xf32>
    %143 = arith.addf %142, %141 : vector<16x1xf32>
    %cst_65 = arith.constant 1.000000e+00 : f32
    %144 = vector.broadcast %cst_65 : f32 to vector<16x1xf32>
    %145 = arith.divf %144, %143 : vector<16x1xf32>
    %cst_66 = arith.constant 9.99999974E-6 : f32
    %146 = vector.broadcast %cst_66 : f32 to vector<16x1xf32>
    %147 = arith.addf %145, %146 : vector<16x1xf32>
    %cst_67 = arith.constant 1.09861231 : f32
    %148 = vector.broadcast %cst_67 : f32 to vector<16x1xf32>
    %149 = arith.mulf %147, %148 : vector<16x1xf32>
    %150 = math.exp %149 : vector<16x1xf32>
    %cst_68 = arith.constant 1.000000e+00 : f32
    %151 = vector.broadcast %cst_68 : f32 to vector<16x1xf32>
    %152 = arith.subf %150, %151 : vector<16x1xf32>
    %153 = vector.shape_cast %152 : vector<16x1xf32> to vector<16x1xf32>
    %154 = vector.broadcast %153 : vector<16x1xf32> to vector<16x16xf32>
    %155 = tpu.reciprocal %154 {approx = true} : vector<16x16xf32> -> vector<16x16xf32>
    %cst_69 = arith.constant 0.398942292 : f32
    %156 = vector.broadcast %cst_69 : f32 to vector<16x16xf32>
    %157 = arith.mulf %156, %155 : vector<16x16xf32>
    %158 = arith.mulf %2, %2 : vector<16x16xf32>
    %cst_70 = arith.constant 0.000000e+00 : f32
    %159 = vector.broadcast %cst_70 : f32 to vector<16x16xf32>
    %160 = arith.subf %159, %158 : vector<16x16xf32>
    %cst_71 = arith.constant 2.000000e+00 : f32
    %161 = vector.broadcast %cst_71 : f32 to vector<16x16xf32>
    %162 = arith.mulf %161, %154 : vector<16x16xf32>
    %163 = arith.mulf %162, %154 : vector<16x16xf32>
    %164 = arith.divf %160, %163 : vector<16x16xf32>
    %165 = math.exp %164 : vector<16x16xf32>
    %166 = arith.mulf %157, %165 : vector<16x16xf32>
    %167 = arith.truncf %138 : vector<16x16xf32> to vector<16x16xbf16>
    %168 = arith.truncf %124 : vector<16x8xf32> to vector<16x8xbf16>
    %cst_72 = arith.constant dense<0.000000e+00> : vector<16x8xf32>
    %169 = tpu.matmul %167, %168, %cst_72 {dimension_numbers = #tpu.dot_dimension_numbers<[1], [0], [0], [1], [0, 0, 1, 1], [], []>} : vector<16x16xbf16>, vector<16x8xbf16>, vector<16x8xf32> -> vector<16x8xf32>
    %c0_73 = arith.constant 0 : index
    %c2 = arith.constant 2 : index
    %c0_74 = arith.constant 0 : index
    %c0_75 = arith.constant 0 : index
    %170 = vector.load %arg16[%c0_73, %c2, %c0_74, %c0_75] : memref<1x4x16x16xf32, #tpu.memory_space<vmem>>, vector<1x1x16x16xf32>
    %171 = vector.shape_cast %170 : vector<1x1x16x16xf32> to vector<16x16xf32>
    %172 = vector.shape_cast %138 : vector<16x16xf32> to vector<1x1x16x16xf32>
    tpu.vector_store %arg16[%c0_73, %c2, %c0_74, %c0_75], %172 {strides = array<i32>} : memref<1x4x16x16xf32, #tpu.memory_space<vmem>>, vector<1x1x16x16xf32>,
    %c0_76 = arith.constant 0 : index
    %c2_77 = arith.constant 2 : index
    %c0_78 = arith.constant 0 : index
    %c0_79 = arith.constant 0 : index
    %173 = vector.load %arg17[%c0_76, %c2_77, %c0_78, %c0_79] : memref<1x4x16x16xf32, #tpu.memory_space<vmem>>, vector<1x1x16x16xf32>
    %174 = vector.shape_cast %173 : vector<1x1x16x16xf32> to vector<16x16xf32>
    %175 = vector.shape_cast %166 : vector<16x16xf32> to vector<1x1x16x16xf32>
    tpu.vector_store %arg17[%c0_76, %c2_77, %c0_78, %c0_79], %175 {strides = array<i32>} : memref<1x4x16x16xf32, #tpu.memory_space<vmem>>, vector<1x1x16x16xf32>,
    %c0_80 = arith.constant 0 : index
    %c2_81 = arith.constant 2 : index
    %c0_82 = arith.constant 0 : index
    %c0_83 = arith.constant 0 : index
    %176 = vector.load %arg18[%c0_80, %c2_81, %c0_82, %c0_83] : memref<1x4x16x16xf32, #tpu.memory_space<vmem>>, vector<1x1x16x16xf32>
    %177 = vector.shape_cast %176 : vector<1x1x16x16xf32> to vector<16x16xf32>
    %178 = vector.shape_cast %154 : vector<16x16xf32> to vector<1x1x16x16xf32>
    tpu.vector_store %arg18[%c0_80, %c2_81, %c0_82, %c0_83], %178 {strides = array<i32>} : memref<1x4x16x16xf32, #tpu.memory_space<vmem>>, vector<1x1x16x16xf32>,
    %179 = vector.extract_strided_slice %7 {offsets = [0, 24], sizes = [16, 8], strides = [1, 1]} : vector<16x128xf32> to vector<16x8xf32>
    %180 = vector.extract_strided_slice %7 {offsets = [0, 56], sizes = [16, 8], strides = [1, 1]} : vector<16x128xf32> to vector<16x8xf32>
    %181 = vector.extract_strided_slice %7 {offsets = [0, 88], sizes = [16, 8], strides = [1, 1]} : vector<16x128xf32> to vector<16x8xf32>
    %182 = vector.extract_strided_slice %7 {offsets = [0, 99], sizes = [16, 1], strides = [1, 1]} : vector<16x128xf32> to vector<16x1xf32>
    %cst_84 = arith.constant dense<0.000000e+00> : vector<16x16xf32>
    %183 = tpu.matmul %179, %180, %cst_84 {dimension_numbers = #tpu.dot_dimension_numbers<[1], [1], [0], [0], [0, 0, 1, 0], [], []>} : vector<16x8xf32>, vector<16x8xf32>, vector<16x16xf32> -> vector<16x16xf32>
    %cst_85 = arith.constant 0.353553385 : f32
    %184 = vector.broadcast %cst_85 : f32 to vector<16x16xf32>
    %185 = arith.mulf %183, %184 : vector<16x16xf32>
    %cst_86 = arith.constant dense<0xFF800000> : vector<16xf32>
    %186 = vector.multi_reduction <maximumf>, %185, %cst_86 [1] : vector<16x16xf32> to vector<16xf32>
    %187 = vector.shape_cast %186 : vector<16xf32> to vector<16x1xf32>
    %188 = vector.broadcast %187 : vector<16x1xf32> to vector<16x16xf32>
    %189 = arith.subf %185, %188 : vector<16x16xf32>
    %190 = math.exp %189 : vector<16x16xf32>
    %cst_87 = arith.constant dense<0.000000e+00> : vector<16xf32>
    %191 = vector.multi_reduction <add>, %190, %cst_87 [1] : vector<16x16xf32> to vector<16xf32>
    %192 = vector.shape_cast %191 : vector<16xf32> to vector<16x1xf32>
    %193 = tpu.reciprocal %192 {approx = true} : vector<16x1xf32> -> vector<16x1xf32>
    %194 = vector.broadcast %193 : vector<16x1xf32> to vector<16x16xf32>
    %195 = arith.mulf %190, %194 : vector<16x16xf32>
    %cst_88 = arith.constant -5.000000e+00 : f32
    %196 = vector.broadcast %cst_88 : f32 to vector<16x1xf32>
    %197 = arith.mulf %196, %182 : vector<16x1xf32>
    %198 = math.exp %197 : vector<16x1xf32>
    %cst_89 = arith.constant 1.000000e+00 : f32
    %199 = vector.broadcast %cst_89 : f32 to vector<16x1xf32>
    %200 = arith.addf %199, %198 : vector<16x1xf32>
    %cst_90 = arith.constant 1.000000e+00 : f32
    %201 = vector.broadcast %cst_90 : f32 to vector<16x1xf32>
    %202 = arith.divf %201, %200 : vector<16x1xf32>
    %cst_91 = arith.constant 9.99999974E-6 : f32
    %203 = vector.broadcast %cst_91 : f32 to vector<16x1xf32>
    %204 = arith.addf %202, %203 : vector<16x1xf32>
    %cst_92 = arith.constant 1.09861231 : f32
    %205 = vector.broadcast %cst_92 : f32 to vector<16x1xf32>
    %206 = arith.mulf %204, %205 : vector<16x1xf32>
    %207 = math.exp %206 : vector<16x1xf32>
    %cst_93 = arith.constant 1.000000e+00 : f32
    %208 = vector.broadcast %cst_93 : f32 to vector<16x1xf32>
    %209 = arith.subf %207, %208 : vector<16x1xf32>
    %210 = vector.shape_cast %209 : vector<16x1xf32> to vector<16x1xf32>
    %211 = vector.broadcast %210 : vector<16x1xf32> to vector<16x16xf32>
    %212 = tpu.reciprocal %211 {approx = true} : vector<16x16xf32> -> vector<16x16xf32>
    %cst_94 = arith.constant 0.398942292 : f32
    %213 = vector.broadcast %cst_94 : f32 to vector<16x16xf32>
    %214 = arith.mulf %213, %212 : vector<16x16xf32>
    %215 = arith.mulf %2, %2 : vector<16x16xf32>
    %cst_95 = arith.constant 0.000000e+00 : f32
    %216 = vector.broadcast %cst_95 : f32 to vector<16x16xf32>
    %217 = arith.subf %216, %215 : vector<16x16xf32>
    %cst_96 = arith.constant 2.000000e+00 : f32
    %218 = vector.broadcast %cst_96 : f32 to vector<16x16xf32>
    %219 = arith.mulf %218, %211 : vector<16x16xf32>
    %220 = arith.mulf %219, %211 : vector<16x16xf32>
    %221 = arith.divf %217, %220 : vector<16x16xf32>
    %222 = math.exp %221 : vector<16x16xf32>
    %223 = arith.mulf %214, %222 : vector<16x16xf32>
    %224 = arith.truncf %195 : vector<16x16xf32> to vector<16x16xbf16>
    %225 = arith.truncf %181 : vector<16x8xf32> to vector<16x8xbf16>
    %cst_97 = arith.constant dense<0.000000e+00> : vector<16x8xf32>
    %226 = tpu.matmul %224, %225, %cst_97 {dimension_numbers = #tpu.dot_dimension_numbers<[1], [0], [0], [1], [0, 0, 1, 1], [], []>} : vector<16x16xbf16>, vector<16x8xbf16>, vector<16x8xf32> -> vector<16x8xf32>
    %c0_98 = arith.constant 0 : index
    %c3 = arith.constant 3 : index
    %c0_99 = arith.constant 0 : index
    %c0_100 = arith.constant 0 : index
    %227 = vector.load %arg16[%c0_98, %c3, %c0_99, %c0_100] : memref<1x4x16x16xf32, #tpu.memory_space<vmem>>, vector<1x1x16x16xf32>
    %228 = vector.shape_cast %227 : vector<1x1x16x16xf32> to vector<16x16xf32>
    %229 = vector.shape_cast %195 : vector<16x16xf32> to vector<1x1x16x16xf32>
    tpu.vector_store %arg16[%c0_98, %c3, %c0_99, %c0_100], %229 {strides = array<i32>} : memref<1x4x16x16xf32, #tpu.memory_space<vmem>>, vector<1x1x16x16xf32>,
    %c0_101 = arith.constant 0 : index
    %c3_102 = arith.constant 3 : index
    %c0_103 = arith.constant 0 : index
    %c0_104 = arith.constant 0 : index
    %230 = vector.load %arg17[%c0_101, %c3_102, %c0_103, %c0_104] : memref<1x4x16x16xf32, #tpu.memory_space<vmem>>, vector<1x1x16x16xf32>
    %231 = vector.shape_cast %230 : vector<1x1x16x16xf32> to vector<16x16xf32>
    %232 = vector.shape_cast %223 : vector<16x16xf32> to vector<1x1x16x16xf32>
    tpu.vector_store %arg17[%c0_101, %c3_102, %c0_103, %c0_104], %232 {strides = array<i32>} : memref<1x4x16x16xf32, #tpu.memory_space<vmem>>, vector<1x1x16x16xf32>,
    %c0_105 = arith.constant 0 : index
    %c3_106 = arith.constant 3 : index
    %c0_107 = arith.constant 0 : index
    %c0_108 = arith.constant 0 : index
    %233 = vector.load %arg18[%c0_105, %c3_106, %c0_107, %c0_108] : memref<1x4x16x16xf32, #tpu.memory_space<vmem>>, vector<1x1x16x16xf32>
    %234 = vector.shape_cast %233 : vector<1x1x16x16xf32> to vector<16x16xf32>
    %235 = vector.shape_cast %211 : vector<16x16xf32> to vector<1x1x16x16xf32>
    tpu.vector_store %arg18[%c0_105, %c3_106, %c0_107, %c0_108], %235 {strides = array<i32>} : memref<1x4x16x16xf32, #tpu.memory_space<vmem>>, vector<1x1x16x16xf32>,
    %236 = tpu.concatenate %55, %112, %169, %226 in 1 : vector<16x8xf32>, vector<16x8xf32>, vector<16x8xf32>, vector<16x8xf32> -> vector<16x32xf32>
    %237 = arith.truncf %236 : vector<16x32xf32> to vector<16x32xbf16>
    %c0_109 = arith.constant 0 : index
    %c0_110 = arith.constant 0 : index
    %238 = vector.load %arg4[%c0_109, %c0_110] : memref<32x32xbf16, #tpu.memory_space<vmem>>, vector<32x32xbf16>
    %cst_111 = arith.constant dense<0.000000e+00> : vector<16x32xf32>
    %239 = tpu.matmul %237, %238, %cst_111 {dimension_numbers = #tpu.dot_dimension_numbers<[1], [0], [0], [1], [0, 0, 1, 1], [], []>} : vector<16x32xbf16>, vector<32x32xbf16>, vector<16x32xf32> -> vector<16x32xf32>
    %c0_112 = arith.constant 0 : index
    %c0_113 = arith.constant 0 : index
    %240 = vector.load %arg5[%c0_112, %c0_113] : memref<1x32xf32, #tpu.memory_space<vmem>>, vector<1x32xf32>
    %241 = vector.broadcast %240 : vector<1x32xf32> to vector<16x32xf32>
    %242 = arith.addf %239, %241 : vector<16x32xf32>
    %243 = arith.addf %1, %242 : vector<16x32xf32>
    %cst_114 = arith.constant dense<0.000000e+00> : vector<16xf32>
    %244 = vector.multi_reduction <add>, %243, %cst_114 [1] : vector<16x32xf32> to vector<16xf32>
    %245 = vector.shape_cast %244 : vector<16xf32> to vector<16x1xf32>
    %cst_115 = arith.constant 3.200000e+01 : f32
    %246 = vector.broadcast %cst_115 : f32 to vector<16x1xf32>
    %247 = arith.divf %245, %246 : vector<16x1xf32>
    %248 = vector.broadcast %247 : vector<16x1xf32> to vector<16x32xf32>
    %249 = arith.subf %243, %248 : vector<16x32xf32>
    %250 = arith.mulf %249, %249 : vector<16x32xf32>
    %cst_116 = arith.constant dense<0.000000e+00> : vector<16xf32>
    %251 = vector.multi_reduction <add>, %250, %cst_116 [1] : vector<16x32xf32> to vector<16xf32>
    %252 = vector.shape_cast %251 : vector<16xf32> to vector<16x1xf32>
    %cst_117 = arith.constant 3.200000e+01 : f32
    %253 = vector.broadcast %cst_117 : f32 to vector<16x1xf32>
    %254 = arith.divf %252, %253 : vector<16x1xf32>
    %cst_118 = arith.constant 9.99999974E-6 : f32
    %255 = vector.broadcast %cst_118 : f32 to vector<16x1xf32>
    %256 = arith.addf %254, %255 : vector<16x1xf32>
    %257 = math.rsqrt %256 : vector<16x1xf32>
    %258 = vector.broadcast %257 : vector<16x1xf32> to vector<16x32xf32>
    %259 = arith.mulf %249, %258 : vector<16x32xf32>
    %c0_119 = arith.constant 0 : index
    %c0_120 = arith.constant 0 : index
    %260 = vector.load %arg10[%c0_119, %c0_120] : memref<1x32xf32, #tpu.memory_space<vmem>>, vector<1x32xf32>
    %261 = vector.broadcast %260 : vector<1x32xf32> to vector<16x32xf32>
    %262 = arith.mulf %259, %261 : vector<16x32xf32>
    %c0_121 = arith.constant 0 : index
    %c0_122 = arith.constant 0 : index
    %263 = vector.load %arg11[%c0_121, %c0_122] : memref<1x32xf32, #tpu.memory_space<vmem>>, vector<1x32xf32>
    %264 = vector.broadcast %263 : vector<1x32xf32> to vector<16x32xf32>
    %265 = arith.addf %262, %264 : vector<16x32xf32>
    %266 = arith.truncf %265 : vector<16x32xf32> to vector<16x32xbf16>
    %c0_123 = arith.constant 0 : index
    %c0_124 = arith.constant 0 : index
    %267 = vector.load %arg6[%c0_123, %c0_124] : memref<32x128xbf16, #tpu.memory_space<vmem>>, vector<32x128xbf16>
    %cst_125 = arith.constant dense<0.000000e+00> : vector<16x128xf32>
    %268 = tpu.matmul %266, %267, %cst_125 {dimension_numbers = #tpu.dot_dimension_numbers<[1], [0], [0], [1], [0, 0, 1, 1], [], []>} : vector<16x32xbf16>, vector<32x128xbf16>, vector<16x128xf32> -> vector<16x128xf32>
    %c0_126 = arith.constant 0 : index
    %c0_127 = arith.constant 0 : index
    %269 = vector.load %arg7[%c0_126, %c0_127] : memref<1x128xf32, #tpu.memory_space<vmem>>, vector<1x128xf32>
    %270 = vector.broadcast %269 : vector<1x128xf32> to vector<16x128xf32>
    %271 = arith.addf %268, %270 : vector<16x128xf32>
    %cst_128 = arith.constant 0.000000e+00 : f32
    %272 = vector.broadcast %cst_128 : f32 to vector<16x128xf32>
    %273 = arith.maximumf %271, %272 : vector<16x128xf32>
    %274 = arith.truncf %273 : vector<16x128xf32> to vector<16x128xbf16>
    %c0_129 = arith.constant 0 : index
    %c0_130 = arith.constant 0 : index
    %275 = vector.load %arg8[%c0_129, %c0_130] : memref<128x32xbf16, #tpu.memory_space<vmem>>, vector<128x32xbf16>
    %cst_131 = arith.constant dense<0.000000e+00> : vector<16x32xf32>
    %276 = tpu.matmul %274, %275, %cst_131 {dimension_numbers = #tpu.dot_dimension_numbers<[1], [0], [0], [1], [0, 0, 1, 1], [], []>} : vector<16x128xbf16>, vector<128x32xbf16>, vector<16x32xf32> -> vector<16x32xf32>
    %c0_132 = arith.constant 0 : index
    %c0_133 = arith.constant 0 : index
    %277 = vector.load %arg9[%c0_132, %c0_133] : memref<1x32xf32, #tpu.memory_space<vmem>>, vector<1x32xf32>
    %278 = vector.broadcast %277 : vector<1x32xf32> to vector<16x32xf32>
    %279 = arith.addf %276, %278 : vector<16x32xf32>
    %280 = arith.addf %265, %279 : vector<16x32xf32>
    %cst_134 = arith.constant dense<0.000000e+00> : vector<16xf32>
    %281 = vector.multi_reduction <add>, %280, %cst_134 [1] : vector<16x32xf32> to vector<16xf32>
    %282 = vector.shape_cast %281 : vector<16xf32> to vector<16x1xf32>
    %cst_135 = arith.constant 3.200000e+01 : f32
    %283 = vector.broadcast %cst_135 : f32 to vector<16x1xf32>
    %284 = arith.divf %282, %283 : vector<16x1xf32>
    %285 = vector.broadcast %284 : vector<16x1xf32> to vector<16x32xf32>
    %286 = arith.subf %280, %285 : vector<16x32xf32>
    %287 = arith.mulf %286, %286 : vector<16x32xf32>
    %cst_136 = arith.constant dense<0.000000e+00> : vector<16xf32>
    %288 = vector.multi_reduction <add>, %287, %cst_136 [1] : vector<16x32xf32> to vector<16xf32>
    %289 = vector.shape_cast %288 : vector<16xf32> to vector<16x1xf32>
    %cst_137 = arith.constant 3.200000e+01 : f32
    %290 = vector.broadcast %cst_137 : f32 to vector<16x1xf32>
    %291 = arith.divf %289, %290 : vector<16x1xf32>
    %cst_138 = arith.constant 9.99999974E-6 : f32
    %292 = vector.broadcast %cst_138 : f32 to vector<16x1xf32>
    %293 = arith.addf %291, %292 : vector<16x1xf32>
    %294 = math.rsqrt %293 : vector<16x1xf32>
    %295 = vector.broadcast %294 : vector<16x1xf32> to vector<16x32xf32>
    %296 = arith.mulf %286, %295 : vector<16x32xf32>
    %c0_139 = arith.constant 0 : index
    %c0_140 = arith.constant 0 : index
    %297 = vector.load %arg12[%c0_139, %c0_140] : memref<1x32xf32, #tpu.memory_space<vmem>>, vector<1x32xf32>
    %298 = vector.broadcast %297 : vector<1x32xf32> to vector<16x32xf32>
    %299 = arith.mulf %296, %298 : vector<16x32xf32>
    %c0_141 = arith.constant 0 : index
    %c0_142 = arith.constant 0 : index
    %300 = vector.load %arg13[%c0_141, %c0_142] : memref<1x32xf32, #tpu.memory_space<vmem>>, vector<1x32xf32>
    %301 = vector.broadcast %300 : vector<1x32xf32> to vector<16x32xf32>
    %302 = arith.addf %299, %301 : vector<16x32xf32>
    %c0_143 = arith.constant 0 : index
    %c0_144 = arith.constant 0 : index
    %c0_145 = arith.constant 0 : index
    %303 = vector.load %arg15[%c0_143, %c0_144, %c0_145] : memref<1x16x32xf32, #tpu.memory_space<vmem>>, vector<1x16x32xf32>
    %304 = vector.shape_cast %303 : vector<1x16x32xf32> to vector<16x32xf32>
    %305 = vector.shape_cast %302 : vector<16x32xf32> to vector<1x16x32xf32>
    tpu.vector_store %arg15[%c0_143, %c0_144, %c0_145], %305 {strides = array<i32>} : memref<1x16x32xf32, #tpu.memory_space<vmem>>, vector<1x16x32xf32>,
    return
  }
  func.func @transform_0(%arg0: i32) -> (i32, i32, i32) {
    %c0_i32 = arith.constant 0 : i32
    %c0_i32_0 = arith.constant 0 : i32
    %c0_i32_1 = arith.constant 0 : i32
    return %arg0, %c0_i32, %c0_i32_0 : i32, i32, i32
  }
  func.func @transform_1(%arg0: i32) -> (i32, i32) {
    %c0_i32 = arith.constant 0 : i32
    %c0_i32_0 = arith.constant 0 : i32
    %c0_i32_1 = arith.constant 0 : i32
    return %c0_i32, %c0_i32_0 : i32, i32
  }
  func.func @transform_2(%arg0: i32) -> (i32, i32) {
    %c0_i32 = arith.constant 0 : i32
    %c0_i32_0 = arith.constant 0 : i32
    %c0_i32_1 = arith.constant 0 : i32
    return %c0_i32, %c0_i32_0 : i32, i32
  }
  func.func @transform_3(%arg0: i32) -> (i32, i32) {
    %c0_i32 = arith.constant 0 : i32
    %c0_i32_0 = arith.constant 0 : i32
    %c0_i32_1 = arith.constant 0 : i32
    return %c0_i32, %c0_i32_0 : i32, i32
  }
  func.func @transform_4(%arg0: i32) -> (i32, i32) {
    %c0_i32 = arith.constant 0 : i32
    %c0_i32_0 = arith.constant 0 : i32
    %c0_i32_1 = arith.constant 0 : i32
    return %c0_i32, %c0_i32_0 : i32, i32
  }
  func.func @transform_5(%arg0: i32) -> (i32, i32) {
    %c0_i32 = arith.constant 0 : i32
    %c0_i32_0 = arith.constant 0 : i32
    %c0_i32_1 = arith.constant 0 : i32
    return %c0_i32, %c0_i32_0 : i32, i32
  }
  func.func @transform_6(%arg0: i32) -> (i32, i32) {
    %c0_i32 = arith.constant 0 : i32
    %c0_i32_0 = arith.constant 0 : i32
    %c0_i32_1 = arith.constant 0 : i32
    return %c0_i32, %c0_i32_0 : i32, i32
  }
  func.func @transform_7(%arg0: i32) -> (i32, i32) {
    %c0_i32 = arith.constant 0 : i32
    %c0_i32_0 = arith.constant 0 : i32
    %c0_i32_1 = arith.constant 0 : i32
    return %c0_i32, %c0_i32_0 : i32, i32
  }
  func.func @transform_8(%arg0: i32) -> (i32, i32) {
    %c0_i32 = arith.constant 0 : i32
    %c0_i32_0 = arith.constant 0 : i32
    %c0_i32_1 = arith.constant 0 : i32
    return %c0_i32, %c0_i32_0 : i32, i32
  }
  func.func @transform_9(%arg0: i32) -> (i32, i32) {
    %c0_i32 = arith.constant 0 : i32
    %c0_i32_0 = arith.constant 0 : i32
    %c0_i32_1 = arith.constant 0 : i32
    return %c0_i32, %c0_i32_0 : i32, i32
  }
  func.func @transform_10(%arg0: i32) -> (i32, i32) {
    %c0_i32 = arith.constant 0 : i32
    %c0_i32_0 = arith.constant 0 : i32
    %c0_i32_1 = arith.constant 0 : i32
    return %c0_i32, %c0_i32_0 : i32, i32
  }
  func.func @transform_11(%arg0: i32) -> (i32, i32) {
    %c0_i32 = arith.constant 0 : i32
    %c0_i32_0 = arith.constant 0 : i32
    %c0_i32_1 = arith.constant 0 : i32
    return %c0_i32, %c0_i32_0 : i32, i32
  }
  func.func @transform_12(%arg0: i32) -> (i32, i32) {
    %c0_i32 = arith.constant 0 : i32
    %c0_i32_0 = arith.constant 0 : i32
    %c0_i32_1 = arith.constant 0 : i32
    return %c0_i32, %c0_i32_0 : i32, i32
  }
  func.func @transform_13(%arg0: i32) -> (i32, i32) {
    %c0_i32 = arith.constant 0 : i32
    %c0_i32_0 = arith.constant 0 : i32
    %c0_i32_1 = arith.constant 0 : i32
    return %c0_i32, %c0_i32_0 : i32, i32
  }
  func.func @transform_14(%arg0: i32) -> (i32, i32, i32) {
    %c0_i32 = arith.constant 0 : i32
    %c0_i32_0 = arith.constant 0 : i32
    %c0_i32_1 = arith.constant 0 : i32
    return %arg0, %c0_i32, %c0_i32_0 : i32, i32, i32
  }
  func.func @transform_15(%arg0: i32) -> (i32, i32, i32, i32) {
    %c0_i32 = arith.constant 0 : i32
    %c0_i32_0 = arith.constant 0 : i32
    %c0_i32_1 = arith.constant 0 : i32
    %c0_i32_2 = arith.constant 0 : i32
    return %arg0, %c0_i32, %c0_i32_0, %c0_i32_1 : i32, i32, i32, i32
  }
  func.func @transform_16(%arg0: i32) -> (i32, i32, i32, i32) {
    %c0_i32 = arith.constant 0 : i32
    %c0_i32_0 = arith.constant 0 : i32
    %c0_i32_1 = arith.constant 0 : i32
    %c0_i32_2 = arith.constant 0 : i32
    return %arg0, %c0_i32, %c0_i32_0, %c0_i32_1 : i32, i32, i32, i32
  }
  func.func @transform_17(%arg0: i32) -> (i32, i32, i32, i32) {
    %c0_i32 = arith.constant 0 : i32
    %c0_i32_0 = arith.constant 0 : i32
    %c0_i32_1 = arith.constant 0 : i32
    %c0_i32_2 = arith.constant 0 : i32
    return %arg0, %c0_i32, %c0_i32_0, %c0_i32_1 : i32, i32, i32, i32
  }
}

</mosaic_0001>

<bundles_post_ra>
// kernel: encoder_layer.1
= control target key start
LH: loop header
LB: loop body
LE: loop exit
PB: predicated region body
PF: predicated region fallthrough
CT: control target
= control target key end

     0   :  { %s4015_s0 = inlined_call_operand.vmem [shape: f32[2,16,32], index: 0, kind: input, shape index: {}]   ;;  %s4016_s1 = inlined_call_operand.vmem [shape: f32[32,128], index: 1, kind: input, shape index: {}]   ;;  %s4017_s2 = inlined_call_operand.vmem [shape: f32[1,128], index: 2, kind: input, shape index: {}]   ;;  %s4018_s3 = inlined_call_operand.vmem [shape: bf16[32,32], index: 3, kind: input, shape index: {}]   ;;  %s4019_s4 = inlined_call_operand.vmem [shape: f32[1,32], index: 4, kind: input, shape index: {}]   ;;  %s4020_s5 = inlined_call_operand.vmem [shape: bf16[32,128], index: 5, kind: input, shape index: {}]   ;;  %s4021_s6 = inlined_call_operand.hbm [shape: f32[1,128], index: 6, kind: input, shape index: {}]   ;;  %s4022_s7 = inlined_call_operand.vmem [shape: bf16[128,32], index: 7, kind: input, shape index: {}]   ;;  %s4023_s8 = inlined_call_operand.hbm [shape: f32[1,32], index: 8, kind: input, shape index: {}]   ;;  %s4024_s9 = inlined_call_operand.hbm [shape: f32[1,32], index: 9, kind: input, shape index: {}]   ;;  %s4025_s10 = inlined_call_operand.hbm [shape: f32[1,32], index: 10, kind: input, shape index: {}]   ;;  %s4026_s11 = inlined_call_operand.hbm [shape: f32[1,32], index: 11, kind: input, shape index: {}]   ;;  %s4027_s12 = inlined_call_operand.hbm [shape: f32[1,32], index: 12, kind: input, shape index: {}]   ;;  %s4028_s13 = inlined_call_operand.hbm [shape: f32[16,16], index: 13, kind: input, shape index: {}]   ;;  %s4029_s14 = inlined_call_operand.hbm [shape: f32[2,16,32], index: 14, kind: output, shape index: {0}]   ;;  %s4030_s15 = inlined_call_operand.hbm [shape: f32[2,4,16,16], index: 15, kind: output, shape index: {1}]   ;;  %s4031_s16 = inlined_call_operand.hbm [shape: f32[2,4,16,16], index: 16, kind: output, shape index: {2}]   ;;  %s4032_s17 = inlined_call_operand.hbm [shape: f32[2,4,16,16], index: 17, kind: output, shape index: {3}]  }
   0x1   :  { %4052 = sst [smem:[#allocation33_spill]] %s4015_s0 }
   0x2   :  { %4053 = sst [smem:[#allocation34_spill]] %s4016_s1 }
   0x3   :  { %4054 = sst [smem:[#allocation35_spill]] %s4017_s2 }
   0x4   :  { %4055 = sst [smem:[#allocation36_spill]] %s4023_s8 }
   0x5   :  { %4056 = sst [smem:[#allocation37_spill]] %s4029_s14 }
   0x6   :  { %4057 = sst [smem:[#allocation38_spill]] %s4031_s16 }
   0x7   :  { %4058 = sst [smem:[#allocation39_spill]] %s4032_s17 }
   0x8   :  { %23 = vsyncpa [#allocation3], 0 }
   0x9   :  { %24 = vsyncpa [#allocation6], 0 }
   0xa   :  { %25 = vsyncpa [#allocation9], 0 }
   0xb   :  { %26 = vsyncpa [#allocation12], 0 }
   0xc   :  { %27 = vsyncpa [#allocation4], 0 }
   0xd   :  { %29 = vsyncpa [#allocation4 + $0x1], 0 }
   0xe   :  { %30 = vsyncpa [#allocation16], 0 }
   0xf   :  { %32 = vsyncpa [#allocation16 + $0x1], 0 }
  0x10   :  { %33 = vsyncpa [#allocation19], 0 }
  0x11   :  { %35 = vsyncpa [#allocation19 + $0x1], 0  ;;  %s3336_s24 = smov 0   ;;  %s3338_s25 = smov 0  }
  0x12   :  { %s3340_s26 = smov 0   ;;  %s3342_s27 = smov 0  }
  0x13 LB: > { %4059 = sst [smem:[#allocation27_spill]] %s3198_s24  ;;  %s3357_s28 = sadd.s32 4294967295, %s3210_s27   ;;  %s3210_s27 = sphi %s3342_s27, %s4098_s27   ;;  %s3206_s26 = sphi %s3340_s26, %s4100_s26   ;;  %s3202_s25 = sphi %s3338_s25, %s4102_s25   ;;  %s3198_s24 = sphi %s3336_s24, %s4101_s24  }
  0x14   : > { %4060 = sst [smem:[#allocation28_spill]] %s3206_s26  ;;  %s4034_s29 = sadd.s32 4294967294, %s3210_s27  }
  0x15   : > { %4061 = sst [smem:[#allocation29_spill]] %s3210_s27  ;;  %s3361_s0 = sadd.s32 1, %s3210_s27  }
  0x16   : > { %4062 = sst [smem:[#allocation30_spill]] %s3361_s0  ;;  %s347_s30 = sadd.s32 1, %s3206_s26 }
  0x17   : > { %s344_s18 = ssub.s32 %s3210_s27, %s3361_s0  ;;  %p357_p0 = scmp.ne.s32.totalorder %s3206_s26, %s3202_s25 }
  0x18   : > { %p345_p1 = scmp.eq.s32.totalorder %s344_s18, 0  ;;  %p358_p2 = scmp.eq.s32.totalorder %s3357_s28, 1 }
  0x19   : > { %p363_p3 = scmp.ne.s32.totalorder %s3202_s25, %s3198_s24  ;;  %p364_p4 = scmp.eq.s32.totalorder %s4034_s29, 1 }
  0x1a   : > { %s3374_s19 = scalar_select %p345_p1, %s3206_s26, %s347_s30  }
  0x1b   : > { %p3376_p5 = por %p358_p2, %p357_p0  ;;  %p3380_p6 = por %p364_p4, %p363_p3 }
  0x1c   : > { %4063 = sst [smem:[#allocation31_spill]] %s3374_s19  ;;  %p2261_p7 = scmp.ge.s32.totalorder %s3210_s27, 1 }
  0x1d   : > { %s4064_s1 = scalar_select %p3376_p5, 1, 0 }
  0x1e   : > { %s4065_s20 = scalar_select %p3380_p6, 1, 0 }
  0x1f   : > { %p449_p8 = scmp.lt.s32.totalorder %s3210_s27, 3  ;;  %p4043_p9 = scmp.eq.s32.totalorder %s3357_s28, 0 }
  0x20   : > { %4066 = sst [smem:[#allocation32_spill]] %s4065_s20  ;;  %s3212_s22 = smov [#allocation5]  }
  0x21   : > { %p3387_p10 = pnand %p2261_p7, %p449_p8  ;;  %s491_s23 = sshll.u32 %s3212_s22, 4  ;;  %s492_s23 = int_to_ptr.vmem [resolvable:$true] %s491_s23 }
  0x22   : > { %s3213_s30 = smov [#allocation8]   ;;  %s3214_s19 = smov [#allocation11]  }
  0x23   : > { %s4067_s21 = scalar_select %p3387_p10, 1, 0 }
  0x24   : > { %p2579_p11 = pneg %p3387_p10  ;;  %s513_s18 = sshll.u32 %s3213_s30, 4  ;;  %s3399_s18 = int_to_ptr.vmem [resolvable:$true] %s513_s18 }
  0x25   : > { %s535_s26 = sshll.u32 %s3214_s19, 4  ;;  %s4069_s8 = sld [smem:[#allocation36_spill]]  ;;  %s3401_s26 = int_to_ptr.vmem [resolvable:$true] %s535_s26 }
  0x26   : > { %p3395_p12 = pnand %p4043_p9, %p2579_p11 }
  0x28   : > { %p3411_p0 = pneg %p3395_p12 }
  0x2b   : > { %s2844_s22 = scalar_lea.hbm %s4069_s8, 16 }
  0x2c   : > { %p2845_p13 = scmp.ne.s32.totalorder %s4069_s8, %s2844_s22  ;;  %p2851_p3 = scmp.lt.u32.totalorder %s2844_s22, %s4069_s8 }
  0x2e   : > { %p2847_p1 = pnand %p3411_p0, %p2845_p13 }
  0x30   : > { %p2848_p2 = pneg %p2847_p1 }
  0x32   : > { %p2853_p4 = pnand %p2851_p3, %p2848_p2 }
  0x34   : > { %2856 = shalt.err (!%p2853_p4)
}
  0x35   : > { %s2857_s0 = scalar_lea.vmem %s492_s23, 16  ;;  %s2864_s24 = scalar_lea.vmem %s492_s23, 32 }
  0x36   : > { %p2858_p7 = scmp.ne.s32.totalorder %s492_s23, %s2857_s0  ;;  %p2865_p9 = scmp.lt.s32.totalorder %s492_s23, %s492_s23 }
  0x37   : > { %p2866_p6 = scmp.lt.s32.totalorder %s2864_s24, %s2857_s0 }
  0x38   : > { %p2860_p8 = pnand %p2858_p7, %p3411_p0 }
  0x39   : > { %p2867_p5 = por %p2866_p6, %p2865_p9 }
  0x3a   : > { %p2861_p11 = pneg %p2860_p8 }
  0x3c   : > { %p2868_p10 = pnand %p2867_p5, %p2861_p11 }
  0x3e   : > { %2871 = shalt.err (!%p2868_p10)
}
  0x3f   : > { %2585 = dma.hbm_to_vmem [thread:$0]  (!%p3395_p12), %s4069_s8, 16, %s492_s23, [#allocation6]  }
  0x40   : > { %s2872_s19 = scalar_lea.hbm %s4025_s10, 16 }
  0x41   : > { %p2873_p13 = scmp.ne.s32.totalorder %s4025_s10, %s2872_s19  ;;  %p2879_p5 = scmp.lt.u32.totalorder %s2872_s19, %s4025_s10 }
  0x43   : > { %p2875_p1 = pnand %p2873_p13, %p3411_p0 }
  0x45   : > { %p2876_p6 = pneg %p2875_p1 }
  0x47   : > { %p2881_p9 = pnand %p2879_p5, %p2876_p6 }
  0x49   : > { %2884 = shalt.err (!%p2881_p9)
}
  0x4a   : > { %s2885_s23 = scalar_lea.vmem %s3399_s18, 16  ;;  %s2892_s16 = scalar_lea.vmem %s3399_s18, 32 }
  0x4b   : > { %p2886_p10 = scmp.ne.s32.totalorder %s3399_s18, %s2885_s23  ;;  %p2893_p4 = scmp.lt.s32.totalorder %s3399_s18, %s3399_s18 }
  0x4c   : > { %p2894_p7 = scmp.lt.s32.totalorder %s2892_s16, %s2885_s23 }
  0x4d   : > { %p2888_p2 = pnand %p2886_p10, %p3411_p0 }
  0x4e   : > { %p2895_p8 = por %p2894_p7, %p2893_p4 }
  0x4f   : > { %p2889_p3 = pneg %p2888_p2 }
  0x51   : > { %p2896_p11 = pnand %p2895_p8, %p2889_p3 }
  0x53   : > { %2899 = shalt.err (!%p2896_p11)
}
  0x54   : > { %2591 = dma.hbm_to_vmem [thread:$0]  (!%p3395_p12), %s4025_s10, 16, %s3399_s18, [#allocation9]  }
  0x55   : > { %s2900_s22 = scalar_lea.hbm %s4027_s12, 16 }
  0x56   : > { %p2901_p13 = scmp.ne.s32.totalorder %s4027_s12, %s2900_s22  ;;  %p2907_p5 = scmp.lt.u32.totalorder %s2900_s22, %s4027_s12 }
  0x58   : > { %p2903_p1 = pnand %p2901_p13, %p3411_p0 }
  0x5a   : > { %p2904_p6 = pneg %p2903_p1 }
  0x5c   : > { %p2909_p9 = pnand %p2907_p5, %p2904_p6 }
  0x5e   : > { %2912 = shalt.err (!%p2909_p9)
}
  0x5f   : > { %s2913_s18 = scalar_lea.vmem %s3401_s26, 16  ;;  %s2920_s16 = scalar_lea.vmem %s3401_s26, 32 }
  0x60   : > { %p2914_p10 = scmp.ne.s32.totalorder %s3401_s26, %s2913_s18  ;;  %p2921_p4 = scmp.lt.s32.totalorder %s3401_s26, %s3401_s26 }
  0x61   : > { %p2922_p7 = scmp.lt.s32.totalorder %s2920_s16, %s2913_s18 }
  0x62   : > { %p2916_p2 = pnand %p2914_p10, %p3411_p0 }
  0x63   : > { %p2923_p8 = por %p2922_p7, %p2921_p4 }
  0x64   : > { %p2917_p3 = pneg %p2916_p2 }
  0x66   : > { %p2924_p11 = pnand %p2923_p8, %p2917_p3 }
  0x68   : > { %2927 = shalt.err (!%p2924_p11)
}
  0x69   : > { %2597 = dma.hbm_to_vmem [thread:$0]  (!%p3395_p12), %s4027_s12, 16, %s3401_s26, [#allocation12]  }
  0x6a   : > { %s3215_s20 = smov [#allocation2]   ;;  %s3216_s22 = smov [#allocation7]  }
  0x6b   : > { %s477_s14 = sshll.u32 %s3215_s20, 4  ;;  %s502_s19 = sshll.u32 %s3216_s22, 4  ;;  %s478_s14 = int_to_ptr.vmem [resolvable:$true] %s477_s14  ;;  %s503_s19 = int_to_ptr.vmem [resolvable:$true] %s502_s19 }
  0x6c   : > { %s2928_s23 = scalar_lea.hbm %s4021_s6, 16 }
  0x6d   : > { %p2929_p13 = scmp.ne.s32.totalorder %s4021_s6, %s2928_s23  ;;  %p2935_p5 = scmp.lt.u32.totalorder %s2928_s23, %s4021_s6 }
  0x6f   : > { %p2931_p1 = pnand %p2929_p13, %p3411_p0 }
  0x71   : > { %p2932_p6 = pneg %p2931_p1 }
  0x73   : > { %p2937_p9 = pnand %p2935_p5, %p2932_p6 }
  0x75   : > { %2940 = shalt.err (!%p2937_p9)
}
  0x76   : > { %s2941_s26 = scalar_lea.vmem %s478_s14, 16  ;;  %s2948_s27 = scalar_lea.vmem %s478_s14, 32 }
  0x77   : > { %p2942_p10 = scmp.ne.s32.totalorder %s478_s14, %s2941_s26  ;;  %p2949_p4 = scmp.lt.s32.totalorder %s478_s14, %s478_s14 }
  0x78   : > { %p2950_p7 = scmp.lt.s32.totalorder %s2948_s27, %s2941_s26 }
  0x79   : > { %p2944_p2 = pnand %p2942_p10, %p3411_p0 }
  0x7a   : > { %p2951_p8 = por %p2950_p7, %p2949_p4 }
  0x7b   : > { %p2945_p3 = pneg %p2944_p2 }
  0x7d   : > { %p2952_p11 = pnand %p2951_p8, %p2945_p3 }
  0x7f   : > { %2955 = shalt.err (!%p2952_p11)
}
  0x80   : > { %2582 = dma.hbm_to_vmem [thread:$0]  (!%p3395_p12), %s4021_s6, 16, %s478_s14, [#allocation3]  }
  0x81   : > { %s2956_s24 = scalar_lea.hbm %s4024_s9, 16 }
  0x82   : > { %p2957_p13 = scmp.ne.s32.totalorder %s4024_s9, %s2956_s24  ;;  %p2963_p5 = scmp.lt.u32.totalorder %s2956_s24, %s4024_s9 }
  0x84   : > { %p2959_p1 = pnand %p2957_p13, %p3411_p0 }
  0x86   : > { %p2960_p6 = pneg %p2959_p1 }
  0x88   : > { %p2965_p9 = pnand %p2963_p5, %p2960_p6 }
  0x8a   : > { %2968 = shalt.err (!%p2965_p9)
}
  0x8b   : > { %s2969_s26 = scalar_lea.vmem %s503_s19, 16  ;;  %s2976_s14 = scalar_lea.vmem %s503_s19, 32 }
  0x8c   : > { %p2970_p10 = scmp.ne.s32.totalorder %s503_s19, %s2969_s26  ;;  %p2977_p4 = scmp.lt.s32.totalorder %s503_s19, %s503_s19 }
  0x8d   : > { %p2978_p7 = scmp.lt.s32.totalorder %s2976_s14, %s2969_s26 }
  0x8e   : > { %p2972_p2 = pnand %p2970_p10, %p3411_p0 }
  0x8f   : > { %p2979_p8 = por %p2978_p7, %p2977_p4 }
  0x90   : > { %p2973_p3 = pneg %p2972_p2 }
  0x92   : > { %p2980_p11 = pnand %p2979_p8, %p2973_p3 }
  0x94   : > { %2983 = shalt.err (!%p2980_p11)
}
  0x95   : > { %2588 = dma.hbm_to_vmem [thread:$0]  (!%p3395_p12), %s4024_s9, 16, %s503_s19, [#allocation6]  }
  0x96   : > { %s3217_s22 = smov [#allocation10]   ;;  %s3218_s0 = smov [#allocation13]  }
  0x97   : > { %s524_s8 = sshll.u32 %s3217_s22, 4  ;;  %s545_s24 = sshll.u32 %s3218_s0, 4  ;;  %s525_s8 = int_to_ptr.vmem [resolvable:$true] %s524_s8  ;;  %s546_s24 = int_to_ptr.vmem [resolvable:$true] %s545_s24 }
  0x98   : > { %s2984_s16 = scalar_lea.hbm %s4026_s11, 16 }
  0x99   : > { %p2985_p13 = scmp.ne.s32.totalorder %s4026_s11, %s2984_s16  ;;  %p2991_p5 = scmp.lt.u32.totalorder %s2984_s16, %s4026_s11 }
  0x9b   : > { %p2987_p1 = pnand %p2985_p13, %p3411_p0 }
  0x9d   : > { %p2988_p6 = pneg %p2987_p1 }
  0x9f   : > { %p2993_p9 = pnand %p2991_p5, %p2988_p6 }
  0xa1   : > { %2996 = shalt.err (!%p2993_p9)
}
  0xa2   : > { %s2997_s19 = scalar_lea.vmem %s525_s8, 16  ;;  %s3004_s20 = scalar_lea.vmem %s525_s8, 32 }
  0xa3   : > { %p2998_p10 = scmp.ne.s32.totalorder %s525_s8, %s2997_s19  ;;  %p3005_p4 = scmp.lt.s32.totalorder %s525_s8, %s525_s8 }
  0xa4   : > { %p3006_p7 = scmp.lt.s32.totalorder %s3004_s20, %s2997_s19 }
  0xa5   : > { %p3000_p2 = pnand %p2998_p10, %p3411_p0 }
  0xa6   : > { %p3007_p8 = por %p3006_p7, %p3005_p4 }
  0xa7   : > { %p3001_p3 = pneg %p3000_p2 }
  0xa9   : > { %p3008_p11 = pnand %p3007_p8, %p3001_p3 }
  0xab   : > { %3011 = shalt.err (!%p3008_p11)
}
  0xac   : > { %2594 = dma.hbm_to_vmem [thread:$0]  (!%p3395_p12), %s4026_s11, 16, %s525_s8, [#allocation9]  }
  0xad   : > { %s3012_s16 = scalar_lea.hbm %s4028_s13, 256 }
  0xae   : > { %p3013_p13 = scmp.ne.s32.totalorder %s4028_s13, %s3012_s16  ;;  %p3019_p5 = scmp.lt.u32.totalorder %s3012_s16, %s4028_s13 }
  0xb0   : > { %p3015_p1 = pnand %p3013_p13, %p3411_p0 }
  0xb2   : > { %p3016_p6 = pneg %p3015_p1 }
  0xb4   : > { %p3021_p9 = pnand %p3019_p5, %p3016_p6 }
  0xb6   : > { %3024 = shalt.err (!%p3021_p9)
}
  0xb7   : > { %s3025_s19 = scalar_lea.vmem %s546_s24, 256  ;;  %p3033_p4 = scmp.lt.s32.totalorder %s546_s24, %s546_s24 }
  0xb8   : > { %p3026_p10 = scmp.ne.s32.totalorder %s546_s24, %s3025_s19  ;;  %p3034_p7 = scmp.lt.s32.totalorder %s3025_s19, %s3025_s19 }
  0xba   : > { %p3028_p2 = pnand %p3026_p10, %p3411_p0  ;;  %p3035_p8 = por %p3034_p7, %p3033_p4 }
  0xbc   : > { %p3029_p3 = pneg %p3028_p2 }
  0xbe   : > { %p3036_p11 = pnand %p3035_p8, %p3029_p3 }
  0xc0   : > { %3039 = shalt.err (!%p3036_p11)
}
  0xc1   : > { %s3219_s8 = smov 128   ;;  %s3220_s20 = smov 8  }
  0xc2   : > { %2600 = dma.hbm_to_vmem [thread:$0]  (!%p3395_p12), %s4028_s13, 256, %s546_s24, [#allocation12], %s3219_s8, %s3219_s8, %s3220_s20  }
  0xc3   : > { %p4071_p13 = scmp.ne.s32.totalorder %s4067_s21, 0 }
  0xc4   : > { %p4072_p1 = scmp.eq.s32.totalorder (!%p4071_p13), %s3357_s28, 0 }
  0xc5   : > { %569 = sbr.rel (%p4071_p13) target bundleno = 3313 (0xcf1), region = 76 }
  0xcc   : > { %3169 = dma.done.wait (%p4072_p1), [#allocation3], 16   ;;  %p4073_p0 = pmov %p4072_p1 }
  0xce   : > { %3171 = vsyncadd (%p4073_p0), [#allocation3], 4294967280  ;;  %p4074_p6 = pmov %p4073_p0 }
  0xcf   : > { %p4075_p5 = pmov %p4073_p0 }
  0xd0   : > { %3173 = dma.done.wait (%p4074_p6), [#allocation6], 32  }
  0xd1   : > { %3175 = vsyncadd (%p4075_p5), [#allocation6], 4294967264  ;;  %p4076_p9 = pmov %p4073_p0 }
  0xd2   : > { %p4077_p12 = pmov %p4073_p0 }
  0xd3   : > { %3177 = dma.done.wait (%p4076_p9), [#allocation9], 32  }
  0xd4   : > { %3179 = vsyncadd (%p4077_p12), [#allocation9], 4294967264  ;;  %p4078_p10 = pmov %p4073_p0 }
  0xd5   : > { %p4079_p2 = pmov %p4073_p0 }
  0xd6   : > { %3181 = dma.done.wait (%p4078_p10), [#allocation12], 272  }
  0xd7   : > { %3183 = vsyncadd (%p4079_p2), [#allocation12], 4294967024  ;;  %p660_p3 = scmp.lt.s32.totalorder %s3357_s28, 1  ;;  %s4080_s23 = sld [smem:[#allocation33_spill]]  ;;  %vm681_vm0 = vcmask 261120   ;;  %vm769_vm1 = vcmask 64512  }
  0xd8   : > { %s4081_s26 = sld [smem:[#allocation34_spill]]  ;;  %s4083_s2 = sld [smem:[#allocation35_spill]]  ;;  %vm3603_vm2 = vmpackc.low %vm769_vm1, %vm769_vm1  ;;  %vm855_vm3 = vcmask 130048   ;;  %v3223_v26 = vmov 0.0   ;;  %vm3230_vm4 = vmmov 0   ;;  %vm1610_vm5 = vcmask 195584  }
  0xd9   : > { %s661_s29 = scalar_select %p660_p3, %s3357_s28, 1 }
  0xda   : > { %s3221_s30 = smov 96   ;;  %s3222_s24 = smov 64  }
  0xdb   : > { %s2362_s21 = sshll.u32 %s661_s29, 4  ;;  %s3226_s16 = smov 80  }
  0xdc   : > { %s3227_s17 = smov 104   ;;  %s3229_s27 = smov 112  }
  0xdd   : > { %s664_s18 = scalar_lea.vmem %s4080_s23, %s2362_s21  ;;  %s3224_s23 = smov 88  }
  0xde   : > { %s4082_s14 = smov %s4081_s26  ;;  %v670_v0 = vld [vmem:[%s4081_s26] sm:$0xff]  ;;  %v3586_v7 = vld [vmem:[%s664_s18 + $0x8] sm:$0xff]  ;;  %s3228_s26 = smov 72  }
  0xdf   : > { %v671_v1 = vld [vmem:[%s4082_s14 + $0x8] sm:$0xff]  ;;  %v672_v2 = vld [vmem:[%s4082_s14 + $0x10] sm:$0xff]  ;;  %v673_v4 = vld [vmem:[%s4082_s14 + $0x18] sm:$0xff]  ;;  %s3642_s19 = sand.u32 1, %s3202_s25   ;;  %s3231_s22 = smov 48  }
  0xe0   : > { %v2511_v3 = vpack.c.bf16 %v671_v1, %v670_v0  ;;  %v3582_v5 = vld [vmem:[%s664_s18] sm:$0xff]  ;;  %v2515_v6 = vpack.c.bf16 %v673_v4, %v672_v2  ;;  %s3225_s18 = smov 120   ;;  %s3645_s8 = sshll.u32 %s3642_s19, 6 }
  0xe1   : > { %2420 = vmatprep.mubr.msk.f32.mxu0 %vm681_vm0, %v3582_v5  ;;  %v2284_v8 = vld [vmem:[%s4083_s2] ss:$0 sm:$0xff]  ;;  %s3648_s20 = scalar_lea.vmem [#allocation15], %s3645_s8  ;;  %s3232_s0 = smov 40  }
  0xe2   : > { %2512 = vmatprep.subr.bf16.mxu0 %v2511_v3  ;;  %s3233_s29 = smov 56   ;;  %p4086_p7 = scmp.ne.s32.totalorder %s4064_s1, 0 }
  0xe3   : > { %2514 = vmatpush3.bf16.msra.mxu0 %v2511_v3 }
  0xe4   : > { %2516 = vmatprep.subr.bf16.mxu0 %v2515_v6 }
  0xe7   : > { %2518 = vmatpush3.bf16.msra.mxu0 %v2515_v6 }
  0xea   : > { %2421 = vmatmul.mubr.msk.f32.vlgmr.msra.gmra.mrb[0].mxu0 %vm681_vm0, %v3586_v7 }
 0x1bd   : > { %v2422_v9 = vpop.f32.mrb[0].mxu0 }
 0x1be   : > { %v3593_v10 = vadd.f32 %v2422_v9, %v2284_v8  ;;  %v754_v11 = vpop.f32.mrb[1].mxu0 }
 0x1bf   : > { %v3595_v12 = vadd.f32 %v2284_v8, %v754_v11 }
 0x1c1   : > { %2427 = vmatprep.mubr.msk.f32.mxu0 %vm769_vm1, %v3595_v12  ;;  %v2691_v13 = vpack.i.bf16 %v3593_v10, %v3595_v12  ;;  %v3617_v25 = vpack.c.bf16 %v3593_v10, %v3595_v12 }
 0x1c3   : > { %2692 = vrot.lane.b32.xlu0 %v2691_v13, %s3221_s30  ;;  %s2004_s30 = sshll.u32 %s3648_s20, 4  ;;  %s3846_s30 = int_to_ptr.vmem [resolvable:$true] %s2004_s30 }
 0x235   : > { %v2693_v14 = vpop.permute.xlu0 %2692 }
 0x236   : > { %v2695_v15 = vunpack.i.h.bf16 %v2693_v14  ;;  %v2694_v16 = vunpack.i.l.bf16 %v2693_v14 }
 0x238   : > { %v2519_v18 = vpack.c.bf16 %v2695_v15, %v2694_v16 }
 0x23a   : > { %2521 = vmatprep.subr.msk.bf16.mxu0 %vm3603_vm2, %v2519_v18 }
 0x23b   : > { %2524 = vmatpush3.bf16.xpose.msk.msra.mxu0 %vm3603_vm2, %v2519_v18 }
 0x23c   : > { %2430 = vmatprep.subr.bf16.mxu0 %v3223_v26 }
 0x242   : > { %2428 = vmatmul.mubr.msk.f32.vlgmr.msra.gmra.mrb[2].mxu0 %vm769_vm1, %v3593_v10 }
 0x243   : > { %2432 = vmatprep.mubr.msk.bf16.mxu0 %vm3230_vm4, %v3223_v26 }
 0x315   : > { %v2429_v19 = vpop.f32.mrb[2].mxu0 }
 0x316   : > { %v854_v20 = vmul.f32 0.35355338, %v2429_v19  ;;  %v844_v21 = vpop.f32.mrb[3].mxu0 }
 0x317   : > { %v853_v22 = vmul.f32 0.35355338, %v844_v21 }
 0x318   : > { %v859_v23 = vsel %vm855_vm3, %v854_v20, -inf }
 0x319   : > { %860 = vmax.xlane.f32.xlu1 %v859_v23  ;;  %v856_v24 = vsel %vm855_vm3, %v853_v22, -inf }
 0x31a   : > { %857 = vmax.xlane.f32.xlu0 %v856_v24 }
 0x32a   : > { %935 = vrot.lane.b32.xlu1 %v3617_v25, %s3222_s24  ;;  %s4048_s24 = smov 8  }
 0x32e   : > { %2697 = vrot.lane.b32.xlu1 %v2691_v13, %s3224_s23 }
 0x330   : > { %988 = vrot.lane.b32.xlu0 %v3595_v12, %s3225_s18 }
 0x332   : > { %2702 = vrot.lane.b32.xlu1 %v2691_v13, %s3226_s16  ;;  %s3235_s16 = smov 16  }
 0x334   : > { %1386 = vrot.lane.b32.xlu0 %v3593_v10, %s3227_s17 }
 0x3a6   : > { %v861_v27 = vpop.xlane.xlu1 %860 }
 0x3a7   : > { %v863_v28 = vsub.f32 %v854_v20, %v861_v27  ;;  %v858_v29 = vpop.xlane.xlu0 %857 }
 0x3a8   : > { %v862_v30 = vsub.f32 %v853_v22, %v858_v29 }
 0x3a9   : > { %v866_v31 = vmul.f32 1.442695, %v863_v28 }
 0x3aa   : > { %v864_v32 = vmul.f32 1.442695, %v862_v30  ;;  %v936_v33 = vpop.permute.xlu1 %935 }
 0x3ab   : > { %2744 = vpow2.f32 %v866_v31  ;;  %2431 = vmatpush3.bf16.msra.mxu0 %v936_v33  ;;  %v989_v59 = vpop.permute.xlu0 %988 }
 0x3ac   : > { %2746 = vpow2.f32 %v864_v32 }
 0x3ae   : > { %v2698_v34 = vpop.permute.xlu1 %2697 }
 0x3af   : > { %v2700_v35 = vunpack.i.h.bf16 %v2698_v34  ;;  %v2699_v36 = vunpack.i.l.bf16 %v2698_v34  ;;  %v1387_v62 = vpop.permute.xlu0 %1386 }
 0x3b1   : > { %v2525_v37 = vpack.c.bf16 %v2700_v35, %v2699_v36 }
 0x3b2   : > { %v2703_v38 = vpop.permute.xlu1 %2702 }
 0x3b3   : > { %v2705_v39 = vunpack.i.h.bf16 %v2703_v38  ;;  %v2704_v40 = vunpack.i.l.bf16 %v2703_v38  ;;  %2527 = vmatprep.subr.msk.bf16.mxu0 %vm3603_vm2, %v2525_v37 }
 0x3b5   : > { %v2745_v41 = vpop.eup %2744  ;;  %v2531_v42 = vpack.c.bf16 %v2705_v39, %v2704_v40 }
 0x3b6   : > { %v871_v43 = vsel %vm855_vm3, %v2745_v41, 0.0  ;;  %v2747_v44 = vpop.eup %2746 }
 0x3b7   : > { %872 = vadd.xlane.f32.xlu1 %v871_v43  ;;  %2533 = vmatprep.subr.msk.bf16.mxu1 %vm3603_vm2, %v2531_v42  ;;  %v868_v45 = vsel %vm855_vm3, %v2747_v44, 0.0 }
 0x3b8   : > { %2536 = vmatpush3.bf16.xpose.msk.msra.mxu1 %vm3603_vm2, %v2531_v42 }
 0x3bb   : > { %869 = vadd.xlane.f32.xlu1 %v868_v45 }
 0x3cc   : > { %990 = vrot.lane.b32.xlu1 %v3593_v10, %s3225_s18  ;;  %s3040_s18 = scalar_lea.vmem %s3846_s30, 1024 }
 0x3cd   : > { %p3041_p4 = scmp.ne.s32.totalorder %s3846_s30, %s3040_s18 }
 0x3cf   : > { %p3042_p8 = pnand %p3041_p4, %p4086_p7 }
 0x3d0   : > { %2707 = vrot.lane.b32.xlu1 %v2691_v13, %s3228_s26  ;;  %s3793_s26 = scalar_lea.vmem [#allocation18], %s3645_s8 }
 0x3d1   : > { %p3043_p11 = pneg %p3042_p8 }
 0x3d4   : > { %1186 = vrot.lane.b32.xlu1 %v3595_v12, %s3229_s27 }
 0x3d8   : > { %1188 = vrot.lane.b32.xlu1 %v3593_v10, %s3229_s27  ;;  %s3825_s27 = scalar_lea.vmem [#allocation17], %s3645_s8  ;;  %s1964_s8 = sand.u32 1, %s3357_s28  }
 0x3d9   : > { %s3850_s23 = scalar_lea.sflag [#allocation16], %s1964_s8 }
 0x3dc   : > { %1384 = vrot.lane.b32.xlu1 %v3595_v12, %s3227_s17  ;;  %s3236_s17 = smov 24  }
 0x444   : > { %v873_v46 = vpop.xlane.xlu1 %872 }
 0x445   : > { %2748 = vrcp.f32 %v873_v46 }
 0x448   : > { %v870_v47 = vpop.xlane.xlu1 %869 }
 0x449   : > { %2750 = vrcp.f32 %v870_v47 }
 0x44c   : > { %v991_v48 = vpop.permute.xlu1 %990 }
 0x44f   : > { %v2749_v49 = vpop.eup %2748 }
 0x450   : > { %v877_v50 = vmul.f32 %v2749_v49, %v2745_v41  ;;  %v2708_v51 = vpop.permute.xlu1 %2707 }
 0x451   : > { %v2710_v52 = vunpack.i.h.bf16 %v2708_v51  ;;  %v2709_v53 = vunpack.i.l.bf16 %v2708_v51 }
 0x452   : > { %983 = vst.msk [vmem:[%s3648_s20 + $0x8] sm:$0xff] %vm855_vm3, %v877_v50 }
 0x453   : > { %v2751_v54 = vpop.eup %2750  ;;  %v2537_v55 = vpack.c.bf16 %v2710_v52, %v2709_v53 }
 0x454   : > { %v876_v56 = vmul.f32 %v2751_v54, %v2747_v44  ;;  %v1187_v57 = vpop.permute.xlu1 %1186 }
 0x455   : > { %2453 = vmatprep.mubr.msk.f32.mxu1 %vm769_vm1, %v1187_v57  ;;  %2539 = vmatprep.subr.msk.bf16.mxu1 %vm3603_vm2, %v2537_v55 }
 0x456   : > { %982 = vst.msk [vmem:[%s3648_s20] sm:$0xff] %vm855_vm3, %v876_v56  ;;  %v932_v58 = vpack.c.bf16 %v877_v50, %v876_v56 }
 0x458   : > { %2433 = vmatmul.mubr.msk.bf16.vlgmr.msra.gmra.mrb[4].mxu0 %vm855_vm3, %v932_v58  ;;  %v1189_v60 = vpop.permute.xlu1 %1188 }
 0x459   : > { %2530 = vmatpush3.bf16.xpose.msk.msra.mxu0 %vm3603_vm2, %v2525_v37  ;;  %2440 = vmatprep.mubr.msk.f32.mxu0 %vm769_vm1, %v989_v59 }
 0x45a   : > { %2454 = vmatmul.mubr.msk.f32.vlgmr.msra.gmra.mrb[0].mxu1 %vm769_vm1, %v1189_v60  ;;  %2443 = vmatprep.subr.bf16.mxu0 %v3223_v26 }
 0x45b   : > { %2542 = vmatpush3.bf16.xpose.msk.msra.mxu1 %vm3603_vm2, %v2537_v55 }
 0x45c   : > { %v1385_v61 = vpop.permute.xlu1 %1384  ;;  %2475 = vmatprep.subr.bf16.mxu1 %v3223_v26 }
 0x45d   : > { %2466 = vmatprep.mubr.msk.f32.mxu1 %vm769_vm1, %v1385_v61 }
 0x460   : > { %2441 = vmatmul.mubr.msk.f32.vlgmr.msra.gmra.mrb[8].mxu0 %vm769_vm1, %v991_v48 }
 0x461   : > { %2445 = vmatprep.mubr.msk.bf16.mxu0 %vm3230_vm4, %v3223_v26 }
 0x462   : > { %2467 = vmatmul.mubr.msk.f32.vlgmr.msra.gmra.mrb[2].mxu1 %vm769_vm1, %v1387_v62 }
 0x463   : > { %2479 = vmatprep.mubr.msk.bf16.mxu1 %vm3230_vm4, %v3223_v26 }
 0x52b   : > { %v3673_v63 = vpop.f32.mrb[4].mxu0 }
 0x52c   : > { %v2434_v0 = vpop.f32.mrb[5].mxu0 }
 0x52d   : > { %v2455_v1 = vpop.f32.mrb[0].mxu1  ;;  %v3675_v2 = vpop.f32.mrb[6].mxu0 }
 0x52e   : > { %v1268_v3 = vpop.f32.mrb[1].mxu1  ;;  %v2435_v4 = vpop.f32.mrb[7].mxu0  ;;  %v1278_v17 = vmul.f32 0.35355338, %v2455_v1 }
 0x52f   : > { %v1277_v14 = vmul.f32 0.35355338, %v1268_v3 }
 0x530   : > { %v1282_v22 = vsel %vm855_vm3, %v1278_v17, -inf }
 0x531   : > { %v1279_v20 = vsel %vm855_vm3, %v1277_v14, -inf }
 0x533   : > { %v2442_v6 = vpop.f32.mrb[8].mxu0 }
 0x534   : > { %v1080_v8 = vmul.f32 0.35355338, %v2442_v6  ;;  %v1070_v9 = vpop.f32.mrb[9].mxu0 }
 0x535   : > { %v2468_v11 = vpop.f32.mrb[2].mxu1  ;;  %v1079_v13 = vmul.f32 0.35355338, %v1070_v9 }
 0x536   : > { %v1466_v15 = vpop.f32.mrb[3].mxu1  ;;  %v1084_v16 = vsel %vm855_vm3, %v1080_v8, -inf  ;;  %v1476_v21 = vmul.f32 0.35355338, %v2468_v11 }
 0x537   : > { %1085 = vmax.xlane.f32.xlu0 %v1084_v16  ;;  %v1081_v18 = vsel %vm855_vm3, %v1079_v13, -inf  ;;  %v1475_v19 = vmul.f32 0.35355338, %v1466_v15 }
 0x538   : > { %1082 = vmax.xlane.f32.xlu1 %v1081_v18  ;;  %v1480_v24 = vsel %vm855_vm3, %v1476_v21, -inf }
 0x539   : > { %v1477_v23 = vsel %vm855_vm3, %v1475_v19, -inf }
 0x53b   : > { %1280 = vmax.xlane.f32.xlu0 %v1279_v20 }
 0x53c   : > { %1283 = vmax.xlane.f32.xlu1 %v1282_v22 }
 0x53f   : > { %1478 = vmax.xlane.f32.xlu0 %v1477_v23 }
 0x540   : > { %1481 = vmax.xlane.f32.xlu1 %v1480_v24 }
 0x5c4   : > { %v1086_v27 = vpop.xlane.xlu0 %1085 }
 0x5c5   : > { %v1083_v28 = vpop.xlane.xlu1 %1082  ;;  %v1088_v35 = vsub.f32 %v1080_v8, %v1086_v27  ;;  %v2732_v27 = vld [vmem:[%s4018_s3] sm:$0xff]  }
 0x5c6   : > { %v1087_v33 = vsub.f32 %v1079_v13, %v1083_v28  ;;  %2476 = vmatpush3.bf16.msra.mxu1 %v2732_v27 }
 0x5c7   : > { %v1091_v43 = vmul.f32 1.442695, %v1088_v35  ;;  %2477 = vmatprep.subr.bf16.mxu1 %v3223_v26 }
 0x5c8   : > { %v1281_v29 = vpop.xlane.xlu0 %1280  ;;  %v1089_v41 = vmul.f32 1.442695, %v1087_v33  ;;  %v2733_v33 = vld [vmem:[%s4018_s3 + $0x8] sm:$0xff]  }
 0x5c9   : > { %v1285_v30 = vsub.f32 %v1277_v14, %v1281_v29  ;;  %v1284_v31 = vpop.xlane.xlu1 %1283 }
 0x5ca   : > { %v1286_v32 = vsub.f32 %v1278_v17, %v1284_v31  ;;  %2478 = vmatpush3.bf16.msra.mxu1 %v2733_v33 }
 0x5cb   : > { %v1287_v34 = vmul.f32 1.442695, %v1285_v30  ;;  %2491 = vmatprep.subr.bf16.mxu1 %v3223_v26 }
 0x5cc   : > { %v1289_v36 = vmul.f32 1.442695, %v1286_v32  ;;  %v1479_v37 = vpop.xlane.xlu0 %1478 }
 0x5cd   : > { %2752 = vpow2.f32 %v1287_v34  ;;  %v1483_v38 = vsub.f32 %v1475_v19, %v1479_v37  ;;  %v1482_v39 = vpop.xlane.xlu1 %1481 }
 0x5ce   : > { %2754 = vpow2.f32 %v1289_v36  ;;  %v1484_v40 = vsub.f32 %v1476_v21, %v1482_v39 }
 0x5cf   : > { %v1485_v42 = vmul.f32 1.442695, %v1483_v38 }
 0x5d0   : > { %v1487_v44 = vmul.f32 1.442695, %v1484_v40 }
 0x5d1   : > { %2756 = vpow2.f32 %v1485_v42 }
 0x5d2   : > { %2758 = vpow2.f32 %v1487_v44 }
 0x5d3   : > { %2760 = vpow2.f32 %v1089_v41 }
 0x5d4   : > { %2762 = vpow2.f32 %v1091_v43 }
 0x5d7   : > { %v2753_v45 = vpop.eup %2752 }
 0x5d8   : > { %v2755_v46 = vpop.eup %2754  ;;  %v1291_v47 = vsel %vm855_vm3, %v2753_v45, 0.0 }
 0x5d9   : > { %1292 = vadd.xlane.f32.xlu0 %v1291_v47  ;;  %v1294_v48 = vsel %vm855_vm3, %v2755_v46, 0.0 }
 0x5da   : > { %1295 = vadd.xlane.f32.xlu1 %v1294_v48 }
 0x5db   : > { %v2757_v49 = vpop.eup %2756 }
 0x5dc   : > { %v2759_v50 = vpop.eup %2758  ;;  %v1489_v51 = vsel %vm855_vm3, %v2757_v49, 0.0 }
 0x5dd   : > { %v2761_v52 = vpop.eup %2760  ;;  %1490 = vadd.xlane.f32.xlu0 %v1489_v51  ;;  %v1492_v53 = vsel %vm855_vm3, %v2759_v50, 0.0 }
 0x5de   : > { %v2763_v54 = vpop.eup %2762  ;;  %1493 = vadd.xlane.f32.xlu1 %v1492_v53  ;;  %v1093_v55 = vsel %vm855_vm3, %v2761_v52, 0.0 }
 0x5df   : > { %v1096_v56 = vsel %vm855_vm3, %v2763_v54, 0.0 }
 0x5e1   : > { %1094 = vadd.xlane.f32.xlu0 %v1093_v55 }
 0x5e2   : > { %1097 = vadd.xlane.f32.xlu1 %v1096_v56 }
 0x5f3   : > { %1328 = vrot.lane.b32.xlu1 %v3617_v25, %s3231_s22  ;;  %s3837_s22 = sshll.u32 %s3357_s28, 10 }
 0x5f4   : > { %s3843_s21 = scalar_lea.hbm %s4030_s15, %s3837_s22 }
 0x5f7   : > { %1526 = vrot.lane.b32.xlu1 %v3617_v25, %s3232_s0  ;;  %1130 = vrot.lane.b32.xlu0 %v3617_v25, %s3233_s29 }
 0x666   : > { %v1293_v57 = vpop.xlane.xlu0 %1292 }
 0x667   : > { %2764 = vrcp.f32 %v1293_v57  ;;  %v1296_v58 = vpop.xlane.xlu1 %1295 }
 0x668   : > { %2766 = vrcp.f32 %v1296_v58 }
 0x66a   : > { %v1491_v59 = vpop.xlane.xlu0 %1490 }
 0x66b   : > { %2768 = vrcp.f32 %v1491_v59  ;;  %v1494_v60 = vpop.xlane.xlu1 %1493 }
 0x66c   : > { %2770 = vrcp.f32 %v1494_v60 }
 0x66e   : > { %v1095_v61 = vpop.xlane.xlu0 %1094 }
 0x66f   : > { %2772 = vrcp.f32 %v1095_v61  ;;  %v1098_v62 = vpop.xlane.xlu1 %1097 }
 0x670   : > { %2774 = vrcp.f32 %v1098_v62 }
 0x671   : > { %v2765_v0 = vpop.eup %2764 }
 0x672   : > { %v2767_v1 = vpop.eup %2766  ;;  %v1299_v3 = vmul.f32 %v2765_v0, %v2753_v45  ;;  %v1131_v25 = vpop.permute.xlu0 %1130 }
 0x673   : > { %v1300_v4 = vmul.f32 %v2767_v1, %v2755_v46  ;;  %2444 = vmatpush3.bf16.msra.mxu0 %v1131_v25  ;;  %v1329_v18 = vpop.permute.xlu1 %1328 }
 0x674   : > { %2310 = vst.msk [vmem:[%s3648_s20 + $0x20] sm:$0xff] %vm855_vm3, %v1299_v3  ;;  %2456 = vmatprep.subr.bf16.mxu0 %v3223_v26 }
 0x675   : > { %v2769_v6 = vpop.eup %2768  ;;  %2311 = vst.msk [vmem:[%s3648_s20 + $0x28] sm:$0xff] %vm855_vm3, %v1300_v4  ;;  %v1327_v19 = vpack.c.bf16 %v1300_v4, %v1299_v3 }
 0x676   : > { %v2771_v8 = vpop.eup %2770  ;;  %v1497_v9 = vmul.f32 %v2769_v6, %v2757_v49 }
 0x677   : > { %v1498_v11 = vmul.f32 %v2771_v8, %v2759_v50  ;;  %v1527_v20 = vpop.permute.xlu1 %1526 }
 0x678   : > { %2321 = vst.msk [vmem:[%s3648_s20 + $0x30] sm:$0xff] %vm855_vm3, %v1497_v9 }
 0x679   : > { %v2773_v13 = vpop.eup %2772  ;;  %2322 = vst.msk [vmem:[%s3648_s20 + $0x38] sm:$0xff] %vm855_vm3, %v1498_v11  ;;  %v1525_v21 = vpack.c.bf16 %v1498_v11, %v1497_v9 }
 0x67a   : > { %v2775_v14 = vpop.eup %2774  ;;  %v1101_v15 = vmul.f32 %v2773_v13, %v2761_v52 }
 0x67b   : > { %v1102_v16 = vmul.f32 %v2775_v14, %v2763_v54 }
 0x67c   : > { %2299 = vst.msk [vmem:[%s3648_s20 + $0x10] sm:$0xff] %vm855_vm3, %v1101_v15 }
 0x67d   : > { %2300 = vst.msk [vmem:[%s3648_s20 + $0x18] sm:$0xff] %vm855_vm3, %v1102_v16  ;;  %v1129_v17 = vpack.c.bf16 %v1102_v16, %v1101_v15  ;;  %v2735_v16 = vld [vmem:[%s4020_s5 + $0x8] sm:$0xff]  }
 0x67f   : > { %2446 = vmatmul.mubr.msk.bf16.vlgmr.msra.gmra.mrb[12].mxu0 %vm855_vm3, %v1129_v17  ;;  %v2736_v17 = vld [vmem:[%s4022_s7] sm:$0xff]  }
 0x680   : > { %2457 = vmatpush3.bf16.msra.mxu0 %v1329_v18  ;;  %2458 = vmatprep.mubr.msk.bf16.mxu0 %vm3230_vm4, %v3223_v26  ;;  %v2737_v18 = vld [vmem:[%s4022_s7 + $0x8] sm:$0xff]  }
 0x681   : > { %2469 = vmatprep.subr.bf16.mxu0 %v3223_v26 }
 0x687   : > { %2459 = vmatmul.mubr.msk.bf16.vlgmr.msra.gmra.mrb[16].mxu0 %vm855_vm3, %v1327_v19  ;;  %v2738_v19 = vld [vmem:[%s4022_s7 + $0x10] sm:$0xff]  }
 0x688   : > { %2470 = vmatpush3.bf16.msra.mxu0 %v1527_v20  ;;  %2471 = vmatprep.mubr.msk.bf16.mxu0 %vm3230_vm4, %v3223_v26  ;;  %v2739_v20 = vld [vmem:[%s4022_s7 + $0x18] sm:$0xff]  }
 0x689   : > { %2483 = vmatprep.subr.bf16.mxu0 %v3223_v26 }
 0x68f   : > { %2472 = vmatmul.mubr.msk.bf16.vlgmr.msra.gmra.mrb[20].mxu0 %vm855_vm3, %v1525_v21  ;;  %v2740_v21 = vld [vmem:[%s4022_s7 + $0x20] sm:$0xff]  }
 0x690   : > { %2487 = vmatprep.mubr.msk.bf16.mxu0 %vm3230_vm4, %v3223_v26 }
 0x752   : > { %v1170_v22 = vpop.f32.mrb[12].mxu0 }
 0x753   : > { %v2447_v23 = vpop.f32.mrb[13].mxu0 }
 0x754   : > { %v1173_v24 = vpop.f32.mrb[14].mxu0 }
 0x755   : > { %v2711_v28 = vpack.i.bf16 %v1173_v24, %v1170_v22  ;;  %v2448_v29 = vpop.f32.mrb[15].mxu0  ;;  %v2741_v22 = vld [vmem:[%s4022_s7 + $0x28] sm:$0xff]  }
 0x757   : > { %2712 = vrot.lane.b32.xlu0 %v2711_v28, %s4048_s24 }
 0x75a   : > { %v1368_v30 = vpop.f32.mrb[16].mxu0 }
 0x75b   : > { %v2460_v31 = vpop.f32.mrb[17].mxu0 }
 0x75c   : > { %v1371_v32 = vpop.f32.mrb[18].mxu0 }
 0x75d   : > { %v2716_v34 = vpack.i.bf16 %v1371_v32, %v1368_v30  ;;  %v2461_v35 = vpop.f32.mrb[19].mxu0  ;;  %v2331_v32 = vld [vmem:[#allocation7] ss:$0 sm:$0xff] }
 0x75f   : > { %2717 = vrot.lane.b32.xlu1 %v2716_v34, %s3235_s16  ;;  %s3241_s16 = smov [#allocation15]  }
 0x762   : > { %v1566_v36 = vpop.f32.mrb[20].mxu0 }
 0x763   : > { %v2473_v37 = vpop.f32.mrb[21].mxu0 }
 0x764   : > { %v1569_v38 = vpop.f32.mrb[22].mxu0  ;;  %v2332_v37 = vld [vmem:[#allocation8] ss:$0 sm:$0xff] }
 0x765   : > { %v2721_v39 = vpack.i.bf16 %v1569_v38, %v1566_v36  ;;  %v2474_v40 = vpop.f32.mrb[23].mxu0 }
 0x767   : > { %2722 = vrot.lane.b32.xlu0 %v2721_v39, %s3236_s17  ;;  %s3044_s17 = sshll.u32 %s3241_s16, 4  ;;  %s3045_s17 = int_to_ptr.vmem [resolvable:$false] %s3044_s17 }
 0x768   : > { %s3046_s20 = scalar_lea.vmem %s3045_s17, 2048  ;;  %p3047_p13 = scmp.lt.s32.totalorder %s3846_s30, %s3045_s17 }
 0x769   : > { %p3048_p1 = scmp.lt.s32.totalorder %s3046_s20, %s3040_s18 }
 0x76b   : > { %p3049_p0 = por %p3048_p1, %p3047_p13 }
 0x76d   : > { %p3050_p6 = pnand %p3049_p0, %p3043_p11 }
 0x7c9   : > { %v2713_v41 = vpop.permute.xlu0 %2712 }
 0x7ca   : > { %v2715_v43 = vunpack.i.h.bf16 %v2713_v41  ;;  %v2714_v44 = vunpack.i.l.bf16 %v2713_v41 }
 0x7cc   : > { %v1607_v48 = vsel %vm769_vm1, %v3675_v2, %v2715_v43  ;;  %v1606_v49 = vsel %vm769_vm1, %v3673_v63, %v2714_v44  ;;  %v2327_v2 = vld [vmem:[%s4019_s4] ss:$0 sm:$0xff]  ;;  %v2743_v43 = vld [vmem:[%s4022_s7 + $0x38] sm:$0xff]  }
 0x7cd   : > { %v2333_v44 = vld [vmem:[#allocation2] ss:$0 sm:$0xff] }
 0x7d1   : > { %v2718_v42 = vpop.permute.xlu1 %2717 }
 0x7d2   : > { %v2720_v45 = vunpack.i.h.bf16 %v2718_v42  ;;  %v2719_v46 = vunpack.i.l.bf16 %v2718_v42  ;;  %v2742_v42 = vld [vmem:[%s4022_s7 + $0x30] sm:$0xff]  }
 0x7d4   : > { %v1609_v52 = vsel %vm855_vm3, %v1607_v48, %v2720_v45  ;;  %v1608_v53 = vsel %vm855_vm3, %v1606_v49, %v2719_v46 }
 0x7d9   : > { %v2723_v47 = vpop.permute.xlu0 %2722 }
 0x7da   : > { %v2725_v50 = vunpack.i.h.bf16 %v2723_v47  ;;  %v2724_v51 = vunpack.i.l.bf16 %v2723_v47 }
 0x7dc   : > { %v1612_v54 = vsel %vm1610_vm5, %v1609_v52, %v2725_v50  ;;  %v1611_v55 = vsel %vm1610_vm5, %v1608_v53, %v2724_v51 }
 0x7dd   : > { %v1613_v56 = vpack.c.bf16 %v1612_v54, %v1611_v55  ;;  %v3237_v54 = vmov 96   ;;  %v878_v55 = vmul.f32 -5.0, %v3595_v12 }
 0x7de   : > { %2727 = vset.pattern.permute.xlu1 %v3237_v54  ;;  %2726 = vset.pattern.permute.xlu0 %v3237_v54 }
 0x7df   : > { %2480 = vmatmul.mubr.msk.bf16.vlgmr.msra.gmra.mrb[4].mxu1 %vm681_vm0, %v1613_v56 }
 0x7e0   : > { %2507 = vmatprep.mubr.msk.bf16.mxu1 %vm3230_vm4, %v3223_v26  ;;  %2492 = vmatpush3.bf16.msra.mxu1 %v2736_v17 }
 0x7e1   : > { %2493 = vmatprep.subr.bf16.mxu1 %v3223_v26 }
 0x7e4   : > { %2494 = vmatpush3.bf16.msra.mxu1 %v2737_v18 }
 0x7e5   : > { %2495 = vmatprep.subr.bf16.mxu1 %v3223_v26 }
 0x7e8   : > { %2496 = vmatpush3.bf16.msra.mxu1 %v2738_v19 }
 0x7e9   : > { %2497 = vmatprep.subr.bf16.mxu1 %v3223_v26 }
 0x7ec   : > { %2498 = vmatpush3.bf16.msra.mxu1 %v2739_v20  ;;  %v3238_v20 = vmov 97  }
 0x7ed   : > { %2499 = vmatprep.subr.bf16.mxu1 %v3223_v26 }
 0x7f0   : > { %2500 = vmatpush3.bf16.msra.mxu1 %v2740_v21  ;;  %v3239_v21 = vmov 99  }
 0x7f1   : > { %2501 = vmatprep.subr.bf16.mxu1 %v3223_v26 }
 0x7f4   : > { %2502 = vmatpush3.bf16.msra.mxu1 %v2741_v22  ;;  %v3240_v22 = vmov 98  }
 0x7f5   : > { %2503 = vmatprep.subr.bf16.mxu1 %v3223_v26 }
 0x7f8   : > { %2504 = vmatpush3.bf16.msra.mxu1 %v2742_v42 }
 0x7f9   : > { %2505 = vmatprep.subr.bf16.mxu1 %v3223_v26 }
 0x7fc   : > { %2506 = vmatpush3.bf16.msra.mxu1 %v2743_v43 }
 0x8b2   : > { %v1674_v57 = vpop.f32.mrb[4].mxu1 }
 0x8b3   : > { %v1675_v63 = vadd.f32 %v2327_v2, %v1674_v57  ;;  %v2481_v58 = vpop.f32.mrb[5].mxu1 }
 0x8b4   : > { %v1677_v59 = vpop.f32.mrb[6].mxu1 }
 0x8b5   : > { %v1678_v60 = vadd.f32 %v2327_v2, %v1677_v59  ;;  %v2482_v61 = vpop.f32.mrb[7].mxu1  ;;  %v1681_v62 = vadd.f32 %v1675_v63, %v3582_v5  ;;  %v880_v2 = vmul.f32 1.442695, %v878_v55 }
 0x8b7   : > { %v1683_v0 = vsel %vm681_vm0, %v1681_v62, 0.0  ;;  %v1682_v1 = vadd.f32 %v1678_v60, %v3586_v7  ;;  %v2734_v7 = vld [vmem:[%s4020_s5] sm:$0xff]  }
 0x8b8   : > { %1684 = vadd.xlane.f32.xlu1 %v1683_v0  ;;  %2484 = vmatpush3.bf16.msra.mxu0 %v2734_v7 }
 0x8b9   : > { %v1686_v3 = vsel %vm681_vm0, %v1682_v1, 0.0  ;;  %2485 = vmatprep.subr.bf16.mxu0 %v3223_v26  ;;  %v879_v26 = vmul.f32 -5.0, %v3593_v10 }
 0x8ba   : > { %1687 = vadd.xlane.f32.xlu0 %v1686_v3 }
 0x8bb   : > { %v882_v56 = vmul.f32 1.442695, %v879_v26 }
 0x8bc   : > { %2486 = vmatpush3.bf16.msra.mxu0 %v2735_v16 }
 0x945   : > { %v1685_v25 = vpop.xlane.xlu1 %1684 }
 0x946   : > { %v1690_v4 = vmul.f32 0.03125, %v1685_v25 }
 0x947   : > { %v1688_v6 = vpop.xlane.xlu0 %1687 }
 0x948   : > { %v1692_v8 = vsub.f32 %v1681_v62, %v1690_v4  ;;  %v1691_v9 = vmul.f32 0.03125, %v1688_v6  ;;  %v2337_v62 = vld [vmem:[#allocation5] ss:$0 sm:$0xff] }
 0x94a   : > { %v1693_v11 = vsub.f32 %v1682_v1, %v1691_v9  ;;  %v1694_v13 = vmul.f32 %v1692_v8, %v1692_v8 }
 0x94c   : > { %v1696_v14 = vsel %vm681_vm0, %v1694_v13, 0.0  ;;  %v1695_v15 = vmul.f32 %v1693_v11, %v1693_v11 }
 0x94d   : > { %1697 = vadd.xlane.f32.xlu0 %v1696_v14 }
 0x94e   : > { %v1699_v5 = vsel %vm681_vm0, %v1695_v15, 0.0 }
 0x94f   : > { %1700 = vadd.xlane.f32.xlu1 %v1699_v5 }
 0x9da   : > { %v1698_v23 = vpop.xlane.xlu0 %1697 }
 0x9db   : > { %v1702_v24 = vmul.f32 0.03125, %v1698_v23 }
 0x9dc   : > { %v1701_v27 = vpop.xlane.xlu1 %1700 }
 0x9dd   : > { %v1704_v28 = vadd.f32 1e-05, %v1702_v24  ;;  %v1703_v29 = vmul.f32 0.03125, %v1701_v27 }
 0x9df   : > { %2776 = vrsqrt.f32 %v1704_v28  ;;  %v1705_v30 = vadd.f32 1e-05, %v1703_v29 }
 0x9e1   : > { %2778 = vrsqrt.f32 %v1705_v30 }
 0x9e2   : > { %2780 = vpow2.f32 %v882_v56 }
 0x9e3   : > { %2782 = vpow2.f32 %v880_v2 }
 0x9e9   : > { %v2777_v31 = vpop.eup %2776 }
 0x9ea   : > { %v1708_v33 = vmul.f32 %v2777_v31, %v1692_v8 }
 0x9eb   : > { %v2779_v34 = vpop.eup %2778 }
 0x9ec   : > { %v1717_v35 = vmul.f32 %v2331_v32, %v1708_v33  ;;  %v1709_v36 = vmul.f32 %v2779_v34, %v1693_v11  ;;  %v2781_v57 = vpop.eup %2780 }
 0x9ed   : > { %v2783_v63 = vpop.eup %2782  ;;  %v885_v58 = vadd.f32 1.0, %v2781_v57 }
 0x9ee   : > { %v1718_v38 = vmul.f32 %v2331_v32, %v1709_v36  ;;  %v1726_v39 = vadd.f32 %v2332_v37, %v1717_v35  ;;  %v884_v59 = vadd.f32 1.0, %v2783_v63 }
 0x9ef   : > { %2784 = vrcp.f32 %v885_v58 }
 0x9f0   : > { %v1727_v40 = vadd.f32 %v2332_v37, %v1718_v38  ;;  %2786 = vrcp.f32 %v884_v59 }
 0x9f2   : > { %v1728_v41 = vpack.c.bf16 %v1727_v40, %v1726_v39 }
 0x9f4   : > { %2488 = vmatmul.mubr.msk.bf16.vlgmr.msra.gmra.mrb[24].mxu0 %vm681_vm0, %v1728_v41  ;;  %v669_v41 = vld [vmem:[#allocation13 + $0x8] sm:$0xff] }
 0x9f9   : > { %v2785_v60 = vpop.eup %2784 }
 0x9fa   : > { %v2787_v61 = vpop.eup %2786  ;;  %v891_v0 = vadd.f32 1e-05, %v2785_v60 }
 0x9fb   : > { %v890_v10 = vadd.f32 1e-05, %v2787_v61 }
 0x9fc   : > { %v893_v12 = vmul.f32 1.0986123, %v891_v0 }
 0x9fd   : > { %v892_v14 = vmul.f32 1.0986123, %v890_v10 }
 0x9fe   : > { %v896_v15 = vmul.f32 1.442695, %v893_v12 }
 0x9ff   : > { %v894_v7 = vmul.f32 1.442695, %v892_v14 }
 0xa00   : > { %2788 = vpow2.f32 %v896_v15 }
 0xa01   : > { %2790 = vpow2.f32 %v894_v7 }
 0xa0a   : > { %v2789_v16 = vpop.eup %2788 }
 0xa0b   : > { %v2791_v17 = vpop.eup %2790  ;;  %v2292_v18 = vadd.f32 -1.0, %v2789_v16 }
 0xa0c   : > { %v2291_v19 = vadd.f32 -1.0, %v2791_v17 }
 0xac7   : > { %v1789_v45 = vpop.f32.mrb[24].mxu0 }
 0xac8   : > { %v1790_v46 = vadd.f32 %v2333_v44, %v1789_v45  ;;  %v2489_v47 = vpop.f32.mrb[25].mxu0 }
 0xac9   : > { %v1792_v48 = vpop.f32.mrb[26].mxu0 }
 0xaca   : > { %v1793_v49 = vadd.f32 %v2333_v44, %v1792_v48  ;;  %v2490_v50 = vpop.f32.mrb[27].mxu0  ;;  %v1796_v51 = vmax.f32 %v1790_v46, 0.0  ;;  %v668_v44 = vld [vmem:[#allocation13] sm:$0xff]  ;;  %v915_v46 = vmul.f32 %v669_v41, %v669_v41 }
 0xacc   : > { %v1797_v52 = vmax.f32 %v1793_v49, 0.0  ;;  %v914_v49 = vmul.f32 %v668_v44, %v668_v44 }
 0xace   : > { %v1798_v53 = vpack.c.bf16 %v1797_v52, %v1796_v51  ;;  %v3807_v51 = vsub.f32 0.0, %v915_v46 }
 0xad0   : > { %2508 = vmatmul.mubr.bf16.vlgmr.msra.gmra.mrb[8].mxu1 %v1798_v53  ;;  %v3809_v53 = vsub.f32 0.0, %v914_v49 }
 0xba3   : > { %v1904_v1 = vpop.f32.mrb[8].mxu1 }
 0xba4   : > { %v1905_v3 = vadd.f32 %v2337_v62, %v1904_v1  ;;  %v2509_v25 = vpop.f32.mrb[9].mxu1 }
 0xba5   : > { %v1907_v4 = vpop.f32.mrb[10].mxu1 }
 0xba6   : > { %v1908_v6 = vadd.f32 %v2337_v62, %v1907_v4  ;;  %v2510_v8 = vpop.f32.mrb[11].mxu1  ;;  %v1911_v9 = vadd.f32 %v1905_v3, %v1726_v39 }
 0xba8   : > { %v1913_v11 = vsel %vm681_vm0, %v1911_v9, 0.0  ;;  %v1912_v13 = vadd.f32 %v1908_v6, %v1727_v40 }
 0xba9   : > { %1914 = vadd.xlane.f32.xlu0 %v1913_v11 }
 0xbaa   : > { %v1916_v5 = vsel %vm681_vm0, %v1912_v13, 0.0 }
 0xbab   : > { %1917 = vadd.xlane.f32.xlu1 %v1916_v5 }
 0xbbc   : > { %907 = vperm.xlu1 %2727, %v2292_v18  }
 0xbbf   : > { %902 = vperm.xlu0 %2726, %v2291_v19  }
 0xbc0   : > { %2728 = vset.pattern.permute.xlu1 %v3238_v20 }
 0xbc1   : > { %1104 = vperm.xlu1 %2728, %v2291_v19  }
 0xbc3   : > { %2731 = vset.pattern.permute.xlu0 %v3239_v21 }
 0xbc5   : > { %1108 = vperm.xlu1 %2728, %v2292_v18  }
 0xbc9   : > { %2729 = vset.pattern.permute.xlu1 %v3240_v22 }
 0xbca   : > { %1302 = vperm.xlu1 %2729, %v2291_v19  }
 0xbce   : > { %1306 = vperm.xlu1 %2729, %v2292_v18  }
 0xbd2   : > { %2730 = vset.pattern.permute.xlu1 %v3239_v21 }
 0xbd3   : > { %1500 = vperm.xlu1 %2730, %v2291_v19  }
 0xbd7   : > { %1504 = vperm.xlu1 %2730, %v2292_v18  }
 0xc36   : > { %v1915_v23 = vpop.xlane.xlu0 %1914 }
 0xc37   : > { %v1919_v24 = vmul.f32 0.03125, %v1915_v23 }
 0xc38   : > { %v1918_v27 = vpop.xlane.xlu1 %1917 }
 0xc39   : > { %v3786_v28 = vsub.f32 %v1911_v9, %v1919_v24  ;;  %v1920_v29 = vmul.f32 0.03125, %v1918_v27 }
 0xc3b   : > { %v3788_v30 = vsub.f32 %v1912_v13, %v1920_v29  ;;  %v1923_v31 = vmul.f32 %v3786_v28, %v3786_v28 }
 0xc3c   : > { %v908_v32 = vpop.permute.xlu1 %907 }
 0xc3d   : > { %v919_v33 = vmul.f32 2.0, %v908_v32  ;;  %987 = vst.msk [vmem:[%s3793_s26 + $0x8] sm:$0xff] %vm855_vm3, %v908_v32  ;;  %v1925_v34 = vsel %vm681_vm0, %v1923_v31, 0.0  ;;  %v1924_v35 = vmul.f32 %v3788_v30, %v3788_v30 }
 0xc3e   : > { %v903_v36 = vpop.permute.xlu0 %902  ;;  %1926 = vadd.xlane.f32.xlu1 %v1925_v34 }
 0xc3f   : > { %v921_v37 = vmul.f32 %v919_v33, %v908_v32  ;;  %v918_v38 = vmul.f32 2.0, %v903_v36  ;;  %986 = vst.msk [vmem:[%s3793_s26] sm:$0xff] %vm855_vm3, %v903_v36  ;;  %v1928_v39 = vsel %vm681_vm0, %v1924_v35, 0.0 }
 0xc40   : > { %1929 = vadd.xlane.f32.xlu0 %v1928_v39  ;;  %v1105_v40 = vpop.permute.xlu1 %1104 }
 0xc41   : > { %2792 = vrcp.f32 %v921_v37  ;;  %v920_v42 = vmul.f32 %v918_v38, %v903_v36  ;;  %v1115_v43 = vmul.f32 2.0, %v1105_v40  ;;  %2303 = vst.msk [vmem:[%s3793_s26 + $0x10] sm:$0xff] %vm855_vm3, %v1105_v40 }
 0xc43   : > { %2794 = vrcp.f32 %v920_v42  ;;  %v1117_v45 = vmul.f32 %v1115_v43, %v1105_v40 }
 0xc44   : > { %v1109_v47 = vpop.permute.xlu1 %1108 }
 0xc45   : > { %2796 = vrcp.f32 %v1117_v45  ;;  %v1116_v48 = vmul.f32 2.0, %v1109_v47  ;;  %2304 = vst.msk [vmem:[%s3793_s26 + $0x18] sm:$0xff] %vm855_vm3, %v1109_v47 }
 0xc47   : > { %v1118_v50 = vmul.f32 %v1116_v48, %v1109_v47 }
 0xc49   : > { %2798 = vrcp.f32 %v1118_v50  ;;  %v1303_v52 = vpop.permute.xlu1 %1302 }
 0xc4a   : > { %v1313_v54 = vmul.f32 2.0, %v1303_v52  ;;  %2314 = vst.msk [vmem:[%s3793_s26 + $0x20] sm:$0xff] %vm855_vm3, %v1303_v52  ;;  %2800 = vrcp.f32 %v908_v32 }
 0xc4b   : > { %v2793_v26 = vpop.eup %2792  ;;  %2802 = vrcp.f32 %v903_v36 }
 0xc4c   : > { %v925_v55 = vmul.f32 %v2793_v26, %v3807_v51  ;;  %v1315_v56 = vmul.f32 %v1313_v54, %v1303_v52 }
 0xc4d   : > { %v2795_v2 = vpop.eup %2794  ;;  %v1307_v57 = vpop.permute.xlu1 %1306 }
 0xc4e   : > { %v928_v63 = vmul.f32 1.442695, %v925_v55  ;;  %v923_v58 = vmul.f32 %v2795_v2, %v3809_v53  ;;  %2804 = vrcp.f32 %v1315_v56  ;;  %v1314_v59 = vmul.f32 2.0, %v1307_v57  ;;  %2315 = vst.msk [vmem:[%s3793_s26 + $0x28] sm:$0xff] %vm855_vm3, %v1307_v57 }
 0xc4f   : > { %v2797_v60 = vpop.eup %2796  ;;  %2806 = vrcp.f32 %v1105_v40 }
 0xc50   : > { %2808 = vpow2.f32 %v928_v63  ;;  %v926_v61 = vmul.f32 1.442695, %v923_v58  ;;  %v1120_v62 = vmul.f32 %v2797_v60, %v3809_v53  ;;  %v1316_v0 = vmul.f32 %v1314_v59, %v1307_v57 }
 0xc51   : > { %2810 = vrcp.f32 %v1109_v47 }
 0xc52   : > { %2812 = vpow2.f32 %v926_v61  ;;  %v1123_v1 = vmul.f32 1.442695, %v1120_v62  ;;  %v1501_v3 = vpop.permute.xlu1 %1500 }
 0xc53   : > { %v2799_v25 = vpop.eup %2798  ;;  %2814 = vrcp.f32 %v1316_v0  ;;  %v1511_v10 = vmul.f32 2.0, %v1501_v3  ;;  %2325 = vst.msk [vmem:[%s3793_s26 + $0x30] sm:$0xff] %vm855_vm3, %v1501_v3 }
 0xc54   : > { %2816 = vpow2.f32 %v1123_v1  ;;  %v1122_v4 = vmul.f32 %v2799_v25, %v3807_v51  ;;  %v2801_v6 = vpop.eup %2800 }
 0xc55   : > { %v1513_v12 = vmul.f32 %v1511_v10, %v1501_v3  ;;  %v2803_v11 = vpop.eup %2802  ;;  %v913_v5 = vmul.f32 0.3989423, %v2801_v6 }
 0xc56   : > { %v1125_v8 = vmul.f32 1.442695, %v1122_v4  ;;  %v1505_v9 = vpop.permute.xlu1 %1504  ;;  %v912_v20 = vmul.f32 0.3989423, %v2803_v11 }
 0xc57   : > { %2818 = vrcp.f32 %v1513_v12  ;;  %v1512_v13 = vmul.f32 2.0, %v1505_v9  ;;  %2326 = vst.msk [vmem:[%s3793_s26 + $0x38] sm:$0xff] %vm855_vm3, %v1505_v9 }
 0xc58   : > { %v2805_v14 = vpop.eup %2804  ;;  %2820 = vpow2.f32 %v1125_v8 }
 0xc59   : > { %v2807_v15 = vpop.eup %2806  ;;  %2822 = vrcp.f32 %v1303_v52  ;;  %v1318_v7 = vmul.f32 %v2805_v14, %v3809_v53  ;;  %v1514_v16 = vmul.f32 %v1512_v13, %v1505_v9 }
 0xc5a   : > { %v2809_v17 = vpop.eup %2808  ;;  %v1113_v27 = vmul.f32 0.3989423, %v2807_v15 }
 0xc5b   : > { %v2811_v18 = vpop.eup %2810  ;;  %v931_v19 = vmul.f32 %v2809_v17, %v913_v5  ;;  %v1321_v21 = vmul.f32 1.442695, %v1318_v7  ;;  %2824 = vrcp.f32 %v1514_v16 }
 0xc5c   : > { %v2813_v22 = vpop.eup %2812  ;;  %v1114_v35 = vmul.f32 0.3989423, %v2811_v18 }
 0xc5d   : > { %v2815_v23 = vpop.eup %2814  ;;  %985 = vst.msk [vmem:[%s3825_s27 + $0x8] sm:$0xff] %vm855_vm3, %v931_v19  ;;  %v930_v24 = vmul.f32 %v2813_v22, %v912_v20  ;;  %2826 = vpow2.f32 %v1321_v21 }
 0xc5e   : > { %v2817_v29 = vpop.eup %2816  ;;  %2828 = vrcp.f32 %v1307_v57  ;;  %v1320_v31 = vmul.f32 %v2815_v23, %v3807_v51 }
 0xc5f   : > { %984 = vst.msk [vmem:[%s3825_s27] sm:$0xff] %vm855_vm3, %v930_v24  ;;  %v1127_v32 = vmul.f32 %v2817_v29, %v1113_v27  ;;  %2830 = vrcp.f32 %v1501_v3 }
 0xc60   : > { %v1323_v33 = vmul.f32 1.442695, %v1320_v31 }
 0xc61   : > { %v2819_v34 = vpop.eup %2818  ;;  %2301 = vst.msk [vmem:[%s3825_s27 + $0x10] sm:$0xff] %vm855_vm3, %v1127_v32 }
 0xc62   : > { %v2821_v36 = vpop.eup %2820  ;;  %2832 = vpow2.f32 %v1323_v33  ;;  %v1516_v37 = vmul.f32 %v2819_v34, %v3809_v53 }
 0xc63   : > { %v2823_v38 = vpop.eup %2822  ;;  %v1128_v39 = vmul.f32 %v2821_v36, %v1114_v35  ;;  %2834 = vrcp.f32 %v1505_v9 }
 0xc64   : > { %v1519_v40 = vmul.f32 1.442695, %v1516_v37 }
 0xc65   : > { %v2825_v41 = vpop.eup %2824  ;;  %2302 = vst.msk [vmem:[%s3825_s27 + $0x18] sm:$0xff] %vm855_vm3, %v1128_v39 }
 0xc66   : > { %3053 = shalt.err (!%p3050_p6)
}
 0xc67   : > { %s3054_s8 = scalar_lea.hbm %s3843_s21, 1024  ;;  %s3058_s16 = scalar_lea.hbm %s4030_s15, 2048 }
 0xc68   : > { %p3055_p5 = scmp.ne.s32.totalorder %s3843_s21, %s3054_s8  ;;  %p3059_p10 = scmp.lt.u32.totalorder %s3843_s21, %s4030_s15 }
 0xc69   : > { %p3060_p2 = scmp.lt.u32.totalorder %s3058_s16, %s3054_s8  ;;  %p3062_p4 = scmp.lt.u32.totalorder %s3054_s8, %s3843_s21 }
 0xc6a   : > { %p3056_p9 = pnand %p3055_p5, %p4086_p7 }
 0xc6b   : > { %p3061_p3 = por %p3060_p2, %p3059_p10 }
 0xc6c   : > { %p3057_p12 = pneg %p3056_p9 }
 0xc6d   : > { %p3063_p8 = por %p3062_p4, %p3061_p3 }
 0xc6f   : > { %p3064_p11 = pnand %p3063_p8, %p3057_p12 }
 0xc71   : > { %3067 = shalt.err (!%p3064_p11)
}
 0xc72   : > { %s4050_s18 = smov 128   ;;  %s4087_s20 = smov 8   ;;  %v1311_v42 = vmul.f32 0.3989423, %v2823_v38  ;;  %2836 = vpow2.f32 %v1519_v40  ;;  %v1518_v43 = vmul.f32 %v2825_v41, %v3807_v51  ;;  %v2827_v44 = vpop.eup %2826 }
 0xc73   : > { %2572 = dma.vmem_to_hbm [thread:$0]  (%p4086_p7), %s3846_s30, 1024, %s3843_s21, %s3850_s23, %s4050_s18, %s4050_s18, %s4087_s20   ;;  %v2829_v45 = vpop.eup %2828 }
 0xc74   : > { %s2036_s24 = sshll.u32 %s3793_s26, 4  ;;  %v1325_v46 = vmul.f32 %v2827_v44, %v1311_v42  ;;  %v1521_v47 = vmul.f32 1.442695, %v1518_v43  ;;  %v2831_v48 = vpop.eup %2830  ;;  %v1312_v49 = vmul.f32 0.3989423, %v2829_v45  ;;  %s4088_s30 = sld [smem:[#allocation39_spill]]  ;;  %s3879_s24 = int_to_ptr.vmem [resolvable:$true] %s2036_s24 }
 0xc75   : > { %v2833_v50 = vpop.eup %2832  ;;  %s3068_s29 = scalar_lea.vmem %s3879_s24, 1024  ;;  %s3243_s16 = smov [#allocation18]  }
 0xc76   : > { %2312 = vst.msk [vmem:[%s3825_s27 + $0x20] sm:$0xff] %vm855_vm3, %v1325_v46  ;;  %2838 = vpow2.f32 %v1521_v47  ;;  %p3069_p13 = scmp.ne.s32.totalorder %s3879_s24, %s3068_s29  ;;  %s3072_s17 = sshll.u32 %s3243_s16, 4  ;;  %s3073_s17 = int_to_ptr.vmem [resolvable:$false] %s3072_s17 }
 0xc77   : > { %s3074_s18 = scalar_lea.vmem %s3073_s17, 2048  ;;  %p3075_p6 = scmp.lt.s32.totalorder %s3879_s24, %s3073_s17 }
 0xc78   : > { %p3070_p1 = pnand %p3069_p13, %p4086_p7  ;;  %p3076_p5 = scmp.lt.s32.totalorder %s3074_s18, %s3068_s29 }
 0xc7a   : > { %s3887_s8 = scalar_lea.hbm %s4088_s30, %s3837_s22  ;;  %p3071_p0 = pneg %p3070_p1 }
 0xc7b   : > { %p3077_p9 = por %p3076_p5, %p3075_p6 }
 0xc7d   : > { %p3078_p12 = pnand %p3077_p9, %p3071_p0 }
 0xc7f   : > { %3081 = shalt.err (!%p3078_p12)
}
 0xc80   : > { %s3082_s26 = scalar_lea.hbm %s3887_s8, 1024  ;;  %s3086_s16 = scalar_lea.hbm %s4088_s30, 2048 }
 0xc81   : > { %p3083_p10 = scmp.ne.s32.totalorder %s3887_s8, %s3082_s26  ;;  %p3087_p4 = scmp.lt.u32.totalorder %s3887_s8, %s4088_s30 }
 0xc82   : > { %p3088_p8 = scmp.lt.u32.totalorder %s3086_s16, %s3082_s26  ;;  %p3090_p13 = scmp.lt.u32.totalorder %s3082_s26, %s3887_s8 }
 0xc83   : > { %p3084_p2 = pnand %p3083_p10, %p4086_p7 }
 0xc84   : > { %p3089_p11 = por %p3088_p8, %p3087_p4 }
 0xc85   : > { %p3085_p3 = pneg %p3084_p2 }
 0xc86   : > { %p3091_p1 = por %p3090_p13, %p3089_p11 }
 0xc88   : > { %p3092_p0 = pnand %p3091_p1, %p3085_p3 }
 0xc8a   : > { %3095 = shalt.err (!%p3092_p0)
}
 0xc8b   : > { %s4089_s18 = smov 128   ;;  %s4090_s29 = scalar_lea.sflag [#allocation19], %s3642_s19  ;;  %v1326_v51 = vmul.f32 %v2833_v50, %v1312_v49  ;;  %v2835_v52 = vpop.eup %2834  ;;  %v1509_v53 = vmul.f32 0.3989423, %v2831_v48 }
 0xc8c   : > { %2574 = dma.vmem_to_hbm [thread:$0]  (%p4086_p7), %s3879_s24, 1024, %s3887_s8, %s4090_s29, %s4089_s18, %s4089_s18, %s4087_s20   ;;  %v2837_v54 = vpop.eup %2836  ;;  %v1510_v55 = vmul.f32 0.3989423, %v2835_v52 }
 0xc8d   : > { %2313 = vst.msk [vmem:[%s3825_s27 + $0x28] sm:$0xff] %vm855_vm3, %v1326_v51  ;;  %v1523_v26 = vmul.f32 %v2837_v54, %v1509_v53  ;;  %s2020_s2 = sshll.u32 %s3825_s27, 4  ;;  %v2839_v56 = vpop.eup %2838  ;;  %s4091_s21 = sld [smem:[#allocation38_spill]]  ;;  %s3927_s2 = int_to_ptr.vmem [resolvable:$true] %s2020_s2 }
 0xc8e   : > { %v1524_v2 = vmul.f32 %v2839_v56, %v1510_v55  ;;  %s3096_s24 = scalar_lea.vmem %s3927_s2, 1024  ;;  %s3244_s8 = smov [#allocation17]  }
 0xc8f   : > { %2323 = vst.msk [vmem:[%s3825_s27 + $0x30] sm:$0xff] %vm855_vm3, %v1523_v26  ;;  %p3097_p6 = scmp.ne.s32.totalorder %s3927_s2, %s3096_s24  ;;  %s3100_s17 = sshll.u32 %s3244_s8, 4  ;;  %s3101_s17 = int_to_ptr.vmem [resolvable:$false] %s3100_s17 }
 0xc90   : > { %2324 = vst.msk [vmem:[%s3825_s27 + $0x38] sm:$0xff] %vm855_vm3, %v1524_v2  ;;  %s3102_s29 = scalar_lea.vmem %s3101_s17, 2048  ;;  %p3103_p12 = scmp.lt.s32.totalorder %s3927_s2, %s3101_s17 }
 0xc91   : > { %p3098_p5 = pnand %p3097_p6, %p4086_p7  ;;  %p3104_p10 = scmp.lt.s32.totalorder %s3102_s29, %s3096_s24 }
 0xc93   : > { %s3925_s16 = scalar_lea.hbm %s4091_s21, %s3837_s22  ;;  %p3099_p9 = pneg %p3098_p5 }
 0xc94   : > { %p3105_p2 = por %p3104_p10, %p3103_p12 }
 0xc96   : > { %p3106_p3 = pnand %p3105_p2, %p3099_p9 }
 0xc98   : > { %3109 = shalt.err (!%p3106_p3)
}
 0xc99   : > { %s3110_s27 = scalar_lea.hbm %s3925_s16, 1024  ;;  %s3114_s26 = scalar_lea.hbm %s4091_s21, 2048 }
 0xc9a   : > { %p3111_p4 = scmp.ne.s32.totalorder %s3925_s16, %s3110_s27  ;;  %p3115_p13 = scmp.lt.u32.totalorder %s3925_s16, %s4091_s21 }
 0xc9b   : > { %p3116_p1 = scmp.lt.u32.totalorder %s3114_s26, %s3110_s27  ;;  %p3118_p6 = scmp.lt.u32.totalorder %s3110_s27, %s3925_s16 }
 0xc9c   : > { %p3112_p8 = pnand %p3111_p4, %p4086_p7 }
 0xc9d   : > { %p3117_p0 = por %p3116_p1, %p3115_p13 }
 0xc9e   : > { %p3113_p11 = pneg %p3112_p8 }
 0xc9f   : > { %p3119_p5 = por %p3118_p6, %p3117_p0 }
 0xca1   : > { %p3120_p9 = pnand %p3119_p5, %p3113_p11 }
 0xca3   : > { %3123 = shalt.err (!%p3120_p9)
}
 0xca4   : > { %2573 = dma.vmem_to_hbm [thread:$0]  (%p4086_p7), %s3927_s2, 1024, %s3925_s16, %s3850_s23, %s4089_s18, %s4089_s18, %s4087_s20   ;;  %v2346_v0 = vld [vmem:[#allocation10] ss:$0 sm:$0xff]  ;;  %v2347_v25 = vld [vmem:[#allocation11] ss:$0 sm:$0xff] }
 0xca5   : > { %s2278_s24 = sshll.u32 %s3642_s19, 4  ;;  %s2363_s23 = sshll.u32 %s3357_s28, 8 }
 0xca6   : > { %s638_s2 = scalar_lea.vmem [#allocation14], %s2278_s24  ;;  %s4092_s22 = sld [smem:[#allocation37_spill]] }
 0xca7   : > { %s1988_s16 = sshll.u32 %s638_s2, 4  ;;  %s1960_s28 = scalar_lea.sflag [#allocation4], %s3642_s19  ;;  %s3966_s16 = int_to_ptr.vmem [resolvable:$true] %s1988_s16 }
 0xca8   : > { %s3124_s26 = scalar_lea.vmem %s3966_s16, 256  ;;  %s3245_s8 = smov [#allocation14]  }
 0xca9   : > { %p3125_p12 = scmp.ne.s32.totalorder %s3966_s16, %s3124_s26  ;;  %s3128_s17 = sshll.u32 %s3245_s8, 4  ;;  %s3129_s17 = int_to_ptr.vmem [resolvable:$false] %s3128_s17 }
 0xcaa   : > { %s3130_s24 = scalar_lea.vmem %s3129_s17, 512  ;;  %p3131_p3 = scmp.lt.s32.totalorder %s3966_s16, %s3129_s17 }
 0xcab   : > { %p3126_p10 = pnand %p3125_p12, %p4086_p7  ;;  %p3132_p4 = scmp.lt.s32.totalorder %s3130_s24, %s3124_s26 }
 0xcac   : > { %s3964_s0 = scalar_lea.hbm %s4092_s22, %s2363_s23 }
 0xcad   : > { %p3127_p2 = pneg %p3126_p10  ;;  %p3133_p8 = por %p3132_p4, %p3131_p3 }
 0xcaf   : > { %p3134_p11 = pnand %p3133_p8, %p3127_p2 }
 0xccb   : > { %v1927_v57 = vpop.xlane.xlu1 %1926 }
 0xccc   : > { %v1931_v63 = vmul.f32 0.03125, %v1927_v57 }
 0xccd   : > { %v1930_v58 = vpop.xlane.xlu0 %1929 }
 0xcce   : > { %v1933_v59 = vadd.f32 1e-05, %v1931_v63  ;;  %v1932_v60 = vmul.f32 0.03125, %v1930_v58 }
 0xcd0   : > { %2840 = vrsqrt.f32 %v1933_v59  ;;  %v1934_v61 = vadd.f32 1e-05, %v1932_v60 }
 0xcd2   : > { %2842 = vrsqrt.f32 %v1934_v61 }
 0xcda   : > { %v2841_v62 = vpop.eup %2840 }
 0xcdb   : > { %v1937_v1 = vmul.f32 %v2841_v62, %v3786_v28 }
 0xcdc   : > { %v2843_v3 = vpop.eup %2842 }
 0xcdd   : > { %v1946_v10 = vmul.f32 %v2346_v0, %v1937_v1  ;;  %v1938_v4 = vmul.f32 %v2843_v3, %v3788_v30 }
 0xcdf   : > { %v1955_v12 = vadd.f32 %v2347_v25, %v1946_v10  ;;  %v1947_v6 = vmul.f32 %v2346_v0, %v1938_v4 }
 0xce1   : > { %v1956_v8 = vadd.f32 %v2347_v25, %v1947_v6  ;;  %1957 = vst.msk [vmem:[%s638_s2] sm:$0xff] %vm681_vm0, %v1955_v12 }
 0xce3   : > { %1958 = vst.msk [vmem:[%s638_s2 + $0x8] sm:$0xff] %vm681_vm0, %v1956_v8 }
 0xce4   : > { %3137 = shalt.err (!%p3134_p11)
}
 0xce5   : > { %s3138_s23 = scalar_lea.hbm %s3964_s0, 256  ;;  %s3142_s27 = scalar_lea.hbm %s4092_s22, 512 }
 0xce6   : > { %p3139_p13 = scmp.ne.s32.totalorder %s3964_s0, %s3138_s23  ;;  %p3143_p6 = scmp.lt.u32.totalorder %s3964_s0, %s4092_s22 }
 0xce7   : > { %p3144_p5 = scmp.lt.u32.totalorder %s3142_s27, %s3138_s23  ;;  %p3146_p12 = scmp.lt.u32.totalorder %s3138_s23, %s3964_s0 }
 0xce8   : > { %p3140_p1 = pnand %p3139_p13, %p4086_p7 }
 0xce9   : > { %p3145_p9 = por %p3144_p5, %p3143_p6 }
 0xcea   : > { %p3141_p0 = pneg %p3140_p1 }
 0xceb   : > { %p3147_p10 = por %p3146_p12, %p3145_p9 }
 0xced   : > { %p3148_p2 = pnand %p3147_p10, %p3141_p0 }
 0xcef   : > { %3151 = shalt.err (!%p3148_p2)
}
 0xcf0   : > { %2571 = dma.vmem_to_hbm [thread:$0]  (%p4086_p7), %s3966_s16, 256, %s3964_s0, %s1960_s28, %s4089_s18, %s4089_s18, %s4087_s20  }
 0xcf1 PF: > { %s4093_s26 = sld [smem:[#allocation29_spill]]  ;;  %s4094_s24 = sld [smem:[#allocation27_spill]] }
 0xcf2   : > { %s4095_s2 = sld [smem:[#allocation32_spill]] }
 0xcf7   : > { %p2628_p3 = scmp.ge.s32.totalorder %s4093_s26, 2  ;;  %s2051_s29 = sand.u32 1, %s4094_s24  }
 0xcf8   : > { %p4096_p4 = scmp.ne.s32.totalorder %s4095_s2, 0  ;;  %s2052_s23 = scalar_lea.sflag [#allocation4], %s2051_s29 }
 0xcfa   : > { %p2602_p8 = pnand %p2628_p3, %p4096_p4 }
 0xcfc   : > { %3185 = dma.done.wait (!%p2602_p8), %s2052_s23, 256  }
 0xcfd   : > { %3187 = vsyncadd (!%p2602_p8), %s2052_s23, 4294967040  ;;  %s4097_s1 = sadd.s32 4294967294, %s4093_s26  }
 0xcfe   : > { %s2060_s27 = sand.u32 1, %s4097_s1  }
 0xcff   : > { %s2061_s8 = scalar_lea.sflag [#allocation16], %s2060_s27 }
 0xd00   : > { %3189 = dma.done.wait (!%p2602_p8), %s2061_s8, 2048  }
 0xd01   : > { %3191 = vsyncadd (!%p2602_p8), %s2061_s8, 4294965248  ;;  %s2079_s19 = scalar_lea.sflag [#allocation19], %s2051_s29 }
 0xd02   : > { %3193 = dma.done.wait (!%p2602_p8), %s2079_s19, 1024  }
 0xd03   : > { %3195 = vsyncadd (!%p2602_p8), %s2079_s19, 4294966272  ;;  %s4098_s27 = sld [smem:[#allocation30_spill]]  ;;  %s4099_s20 = sld [smem:[#allocation28_spill]] }
 0xd04   : > { %s4100_s26 = sld [smem:[#allocation31_spill]]  ;;  %s4101_s24 = smov %s3202_s25 }
 0xd09   : > { %p38_p7 = scmp.ge.s32.totalorder %s4098_s27, 4   ;;  %s4102_s25 = smov %s4099_s20 }
 0xd0b   :  { %40 = sbr.rel (!%p38_p7) target bundleno = 19 (0x13), region = 198 }
 0xd12   :  { %2084 = vsyncpa [#allocation3], 1 }
 0xd13   :  { %2086 = vsyncpa [#allocation3 + $0x1], 1 }
 0xd14   :  { %2087 = vsyncpa [#allocation6], 1 }
 0xd15   :  { %2088 = vsyncpa [#allocation9], 1 }
 0xd16   :  { %2089 = vsyncpa [#allocation12], 1 }
 0xd17   :  { %2090 = vsyncpa [#allocation4], 1 }
 0xd18   :  { %2092 = vsyncpa [#allocation4 + $0x1], 1 }
 0xd19   :  { %2093 = vsyncpa [#allocation16], 1 }
 0xd1a   :  { %2095 = vsyncpa [#allocation16 + $0x1], 1 }
 0xd1b   :  { %2096 = vsyncpa [#allocation19], 1 }
 0xd1c   :  { %2098 = vsyncpa [#allocation19 + $0x1], 1 }

</bundles_post_ra>
